<compile_context>
chip_gen: v5e
topology: v5e:2x2
jax: 0.10.0
libtpu: 0.0.40
codegen_flags: <defaults>
</compile_context>

<pallas_src>
import functools

import numpy as np
import jax
import jax.numpy as jnp
from jax import lax
from jax.experimental import pallas as pl
from jax.experimental.pallas import tpu as pltpu


def _round_up(v, m):
    return ((v + m - 1) // m) * m


def _silu(v):
    return v * jax.nn.sigmoid(v)


def _vmem_capacity_bytes():
    try:
        return int(pltpu.get_tpu_info().vmem_capacity_bytes)
    except Exception:
        return 64 << 20          # conservative (v7x-sized) fallback


def gnn_kernel(bs_ref, bc_ref, row_ref, ein_ref, x_ref,
               we1_ref, we2_ref, wn1_ref, wn2_ref, b_ref,
               out_ref, agg_ref, iota_ref, *, fpad, hid, opad, node_tile):
    f32 = jnp.float32
    n = pl.program_id(0)
    e = pl.program_id(1)
    b = b_ref[...]                                   # (4, B_pad) packed biases

    # -- per-node-tile init (first edge step) --------------------------------
    @pl.when(e == 0)
    def _():
        agg_ref[...] = jnp.zeros_like(agg_ref)
        iota_ref[...] = lax.broadcasted_iota(jnp.int32, iota_ref.shape, 0)

    # -- edge MLP + segment-sum, only on blocks belonging to this node tile --
    @pl.when(e < bc_ref[n])
    def _():
        eh = (jnp.dot(ein_ref[...], we1_ref[...], preferred_element_type=f32)
              + b[0:1, :hid])
        eh = _silu(eh)
        ef = (jnp.dot(eh, we2_ref[...], preferred_element_type=f32)
              + b[1:2, :hid])
        ef = _silu(ef)                                           # [TE, H]

        # One-hot built already transposed: edges on the lane axis, node ids
        # on the (cached) sublane iota -> canonical [TN,TE]@[TE,H], no vxpose.
        local = row_ref[...] - n * node_tile                     # [1, TE]
        onehot_t = (iota_ref[...] == local).astype(f32)          # [TN, TE]
        # TODO(synk): cast onehot_t/ef to bf16 on v6e/v7x for MXU throughput
        # (exceeds the 2e-4 validation tolerance used here, so kept f32).
        agg_ref[...] += jnp.dot(onehot_t, ef, preferred_element_type=f32)

    # -- node MLP + lane-dense store once the tile's edges are accumulated ---
    @pl.when(e == pl.num_programs(1) - 1)
    def _():
        nh = (jnp.dot(x_ref[...], wn1_ref[:fpad, :], preferred_element_type=f32)
              + jnp.dot(agg_ref[...], wn1_ref[fpad:, :],
                        preferred_element_type=f32)
              + b[2:3, :hid])
        nh = _silu(nh)
        out_ref[...] = (jnp.dot(nh, wn2_ref[...], preferred_element_type=f32)
                        + b[3:4, :opad])


def gnn_layer_pallas(x, edge_features, edge_idx, params,
                     *, edge_tile=None, node_tile=256):
    # NOTE: the wrapper builds the per-node-tile edge schedule host-side
    # (sort + searchsorted), so it is meant to be called eagerly, not jitted.
    N, F = x.shape
    E, EF = edge_features.shape
    H = params["we1"].shape[1]
    O = params["wn2"].shape[1]
    CIN = 2 * F + EF
    f32 = jnp.float32

    # ---- padded, lane/sublane-friendly layout -------------------------------
    F_pad = _round_up(F, 8)                  # aligned split point inside wn1
    O_pad = _round_up(O, 128)                # lane-dense output store
    B_pad = _round_up(max(H, O), 128)        # packed-bias width (handles H > O_pad)
    TN = min(_round_up(node_tile, 8), _round_up(N, 8))
    N_pad = _round_up(N, TN)
    n_tiles = N_pad // TN

    # ---- edge tile: lane-padding-aware sizer, generation-aware budget -------
    vmem_cap = _vmem_capacity_bytes()
    if vmem_cap >= (96 << 20):               # v5e / v6e: 128 MiB physical VMEM
        ws_budget, vmem_limit = 40 << 20, 64 << 20
    else:                                    # v7x: 64 MiB physical VMEM
        ws_budget, vmem_limit = 20 << 20, 48 << 20
    if edge_tile is None:
        # Per-edge VMEM (f32, lane-padded): 2x double-buffered [TE, CIN->128]
        # edge inputs, 2x [1->8, TE] row ids, 2x [TE, H->128] MLP
        # intermediates, [TN, TE] one-hot + [TN, TE] cached iota.
        per_edge = 4 * (2 * _round_up(CIN, 128) + 2 * 8
                        + 2 * _round_up(H, 128) + 2 * TN)
        fixed = 4 * (2 * TN * (_round_up(F_pad, 128) + O_pad)
                     + TN * _round_up(H, 128)) + (2 << 20)
        edge_tile = max(512, (ws_budget - fixed) // per_edge)
    TE = max(128, (min(int(edge_tile), 4096) // 128) * 128)
    TE = min(TE, _round_up(E, 128))
    E_pad = _round_up(E, TE)
    e_blocks = E_pad // TE

    # ---- host-side edge sort + per-node-tile block schedule -----------------
    ei = np.asarray(jax.device_get(edge_idx)).astype(np.int32)
    order = np.argsort(ei[0], kind="stable")
    row_sorted = ei[0][order]
    col_sorted = ei[1][order]

    # TODO(synk): for very large E, move the src/tgt gathers in-kernel via
    # scalar-prefetched edge indices; kept as host-side XLA gathers here.
    src = x[row_sorted]
    tgt = x[col_sorted]
    edge_in = jnp.concatenate([src, tgt, edge_features[order]], axis=-1)
    edge_in = jnp.pad(edge_in.astype(f32), ((0, E_pad - E), (0, 0)))  # [E_pad, CIN]

    row_lanes = np.full((1, E_pad), -1, np.int32)     # padded edges: id -1
    row_lanes[0, :E] = row_sorted
    row_lanes = jnp.asarray(row_lanes)                # [1, E_pad] (lane-dense)

    seg = np.searchsorted(row_sorted,
                          np.arange(n_tiles + 1, dtype=np.int64) * TN,
                          side="left")
    blk_lo = seg[:-1] // TE
    blk_hi = -(-seg[1:] // TE)                        # ceil-div
    blk_count = np.maximum(blk_hi - blk_lo, 1).astype(np.int32)
    blk_start = np.clip(blk_lo, 0, e_blocks - 1).astype(np.int32)
    e_steps = int(blk_count.max())
    active_blocks = int(blk_count.sum())

    x_pad = jnp.pad(x.astype(f32), ((0, N_pad - N), (0, F_pad - F)))

    wn1 = params["wn1"]
    wn1_pad = jnp.concatenate(
        [jnp.pad(wn1[:F], ((0, F_pad - F), (0, 0))), wn1[F:]], axis=0)   # [F_pad+H, H]
    wn2_pad = jnp.pad(params["wn2"], ((0, 0), (0, O_pad - O)))           # [H, O_pad]

    biases = jnp.zeros((4, B_pad), f32)
    biases = biases.at[0, :H].set(params["be1"])
    biases = biases.at[1, :H].set(params["be2"])
    biases = biases.at[2, :H].set(params["bn1"])
    biases = biases.at[3, :O].set(params["bn2"])

    def eblk(n, e, bs, bc):
        # Clamp trailing steps to the tile's last block so they reuse the
        # already-resident block (no extra DMA); compute is skipped in-kernel.
        return bs[n] + jnp.minimum(e, bc[n] - 1)

    kernel = functools.partial(gnn_kernel, fpad=F_pad, hid=H, opad=O_pad,
                               node_tile=TN)

    flops = (active_blocks * (2 * TE * (CIN * H + H * H) + 2 * TE * TN * H)
             + 2 * N_pad * ((F_pad + H) * H + H * O_pad))
    transcendentals = active_blocks * 2 * TE * H + N_pad * H
    bytes_accessed = 4 * (active_blocks * TE * (CIN + 1)
                          + N_pad * (F_pad + O_pad)
                          + (CIN + H + F_pad + H) * H + H * O_pad + 4 * B_pad)
    cost = pl.CostEstimate(flops=flops, transcendentals=transcendentals,
                           bytes_accessed=bytes_accessed)

    grid_spec = pltpu.PrefetchScalarGridSpec(
        num_scalar_prefetch=2,
        grid=(n_tiles, e_steps),
        in_specs=[
            pl.BlockSpec((1, TE), lambda n, e, bs, bc: (0, eblk(n, e, bs, bc))),
            pl.BlockSpec((TE, CIN), lambda n, e, bs, bc: (eblk(n, e, bs, bc), 0)),
            pl.BlockSpec((TN, F_pad), lambda n, e, bs, bc: (n, 0)),
            pl.BlockSpec((CIN, H), lambda n, e, bs, bc: (0, 0)),           # we1
            pl.BlockSpec((H, H), lambda n, e, bs, bc: (0, 0)),             # we2
            pl.BlockSpec((F_pad + H, H), lambda n, e, bs, bc: (0, 0)),     # wn1
            pl.BlockSpec((H, O_pad), lambda n, e, bs, bc: (0, 0)),         # wn2
            pl.BlockSpec((4, B_pad), lambda n, e, bs, bc: (0, 0)),         # biases
        ],
        out_specs=pl.BlockSpec((TN, O_pad), lambda n, e, bs, bc: (n, 0)),
        scratch_shapes=[pltpu.VMEM((TN, H), f32),              # agg accumulator
                        pltpu.VMEM((TN, TE), jnp.int32)],      # cached sublane iota
    )

    out_pad = pl.pallas_call(
        kernel,
        out_shape=jax.ShapeDtypeStruct((N_pad, O_pad), f32),
        grid_spec=grid_spec,
        compiler_params=pltpu.CompilerParams(
            dimension_semantics=("parallel", "arbitrary"),
            vmem_limit_bytes=vmem_limit),
        cost_estimate=cost,
    )(jnp.asarray(blk_start), jnp.asarray(blk_count),
      row_lanes, edge_in, x_pad,
      params["we1"].astype(f32), params["we2"].astype(f32),
      wn1_pad, wn2_pad, biases)

    return out_pad[:N, :O]


def gnn_layer_ref(x, edge_features, edge_idx, params):
    """Pure-JAX reference mirroring the PyTorch forward."""
    src = x[edge_idx[0]]
    tgt = x[edge_idx[1]]
    edge_in = jnp.concatenate([src, tgt, edge_features], axis=-1)
    h1 = jax.nn.silu(edge_in @ params["we1"] + params["be1"])
    edge_feat = jax.nn.silu(h1 @ params["we2"] + params["be2"])
    agg = jax.ops.segment_sum(edge_feat, edge_idx[0], num_segments=x.shape[0])
    node_in = jnp.concatenate([x, agg], axis=-1)
    nh = jax.nn.silu(node_in @ params["wn1"] + params["bn1"])
    return nh @ params["wn2"] + params["bn2"]


def init_params(key, input_nf, output_nf, hidden_nf, input_ef):
    """Deterministic PyTorch-Linear-style init; weights stored as [in, out]."""
    def linear(k, fan_in, fan_out):
        kw, kb = jax.random.split(k)
        bound = 1.0 / jnp.sqrt(fan_in)
        w = jax.random.uniform(kw, (fan_in, fan_out), jnp.float32, -bound, bound)
        b = jax.random.uniform(kb, (fan_out,), jnp.float32, -bound, bound)
        return w, b

    k1, k2, k3, k4 = jax.random.split(key, 4)
    we1, be1 = linear(k1, 2 * input_nf + input_ef, hidden_nf)
    we2, be2 = linear(k2, hidden_nf, hidden_nf)
    wn1, bn1 = linear(k3, hidden_nf + input_nf, hidden_nf)
    wn2, bn2 = linear(k4, hidden_nf, output_nf)
    return dict(we1=we1, be1=be1, we2=we2, be2=be2,
                wn1=wn1, bn1=bn1, wn2=wn2, bn2=bn2)


def _make_graph(key, n_nodes, input_nf, input_ef):
    """Fully-connected directed graph without self loops."""
    k_x, k_e = jax.random.split(key)
    idx = jnp.arange(n_nodes)
    rr, cc = jnp.meshgrid(idx, idx, indexing="ij")
    mask = rr != cc
    edge_idx = jnp.stack([rr[mask], cc[mask]]).astype(jnp.int32)   # [2, E]
    E = edge_idx.shape[1]
    x = jax.random.normal(k_x, (n_nodes, input_nf), jnp.float32)
    ef = jax.random.normal(k_e, (E, input_ef), jnp.float32)
    return x, ef, edge_idx


if __name__ == "__main__":
    INPUT_NF, OUTPUT_NF, HIDDEN_NF, INPUT_EF = 4, 4, 32, 2

    key = jax.random.PRNGKey(0)
    k_p, k_g1, k_g2 = jax.random.split(key, 3)
    params = init_params(k_p, INPUT_NF, OUTPUT_NF, HIDDEN_NF, INPUT_EF)

    # Config 1: small tiles, 3 node tiles x 5 edge blocks -> exercises the
    #   sorted-edge schedule (shared boundary blocks, clamped/skipped steps,
    #   multi-step accumulation).
    # Config 2: production defaults (auto edge tile, node_tile=256) on a
    #   slightly larger graph -> exercises the VMEM auto-sizer path.
    configs = [
        dict(n_nodes=24, edge_tile=128, node_tile=8),
        dict(n_nodes=64, edge_tile=None, node_tile=256),
    ]

    for cfg, kg in zip(configs, (k_g1, k_g2)):
        x, edge_features, edge_idx = _make_graph(kg, cfg["n_nodes"],
                                                 INPUT_NF, INPUT_EF)
        out = gnn_layer_pallas(x, edge_features, edge_idx, params,
                               edge_tile=cfg["edge_tile"],
                               node_tile=cfg["node_tile"])
        jax.block_until_ready(out)

        ref = gnn_layer_ref(x, edge_features, edge_idx, params)
        assert out.shape == (cfg["n_nodes"], OUTPUT_NF)
        assert jnp.allclose(out, ref, atol=2e-4, rtol=2e-4), \
            f"mismatch vs reference for config {cfg}"

    print("KERNEL_OK")
</pallas_src>

<mosaic_0001>
module attributes {stable_mosaic.version = 11 : i64} {
  func.func @gnn_kernel(%arg0: i32, %arg1: i32, %arg2: memref<3xi32, #tpu.memory_space<smem>>, %arg3: memref<3xi32, #tpu.memory_space<smem>>, %arg4: memref<1x128xi32, #tpu.memory_space<vmem>>, %arg5: memref<128x10xf32, #tpu.memory_space<vmem>>, %arg6: memref<8x8xf32, #tpu.memory_space<vmem>>, %arg7: memref<10x32xf32, #tpu.memory_space<vmem>>, %arg8: memref<32x32xf32, #tpu.memory_space<vmem>>, %arg9: memref<40x32xf32, #tpu.memory_space<vmem>>, %arg10: memref<32x128xf32, #tpu.memory_space<vmem>>, %arg11: memref<4x128xf32, #tpu.memory_space<vmem>>, %arg12: memref<8x128xf32, #tpu.memory_space<vmem>>, %arg13: memref<8x32xf32, #tpu.memory_space<vmem>>, %arg14: memref<8x128xi32, #tpu.memory_space<vmem>>) attributes {dimension_semantics = [#tpu.dimension_semantics<parallel>, #tpu.dimension_semantics<arbitrary>], iteration_bounds = array<i64: 3, 3>, scalar_prefetch = 2 : i64, scratch_operands = 2 : i64, tpu.core_type = #tpu.core_type<tc>, window_params = [{transform_indices = @transform_0, window_bounds = array<i64: 1, 128>}, {transform_indices = @transform_1, window_bounds = array<i64: 128, 10>}, {transform_indices = @transform_2, window_bounds = array<i64: 8, 8>}, {pipeline_mode = #tpu.pipeline_mode<synchronous>, transform_indices = @transform_3, window_bounds = array<i64: 10, 32>}, {pipeline_mode = #tpu.pipeline_mode<synchronous>, transform_indices = @transform_4, window_bounds = array<i64: 32, 32>}, {pipeline_mode = #tpu.pipeline_mode<synchronous>, transform_indices = @transform_5, window_bounds = array<i64: 40, 32>}, {pipeline_mode = #tpu.pipeline_mode<synchronous>, transform_indices = @transform_6, window_bounds = array<i64: 32, 128>}, {pipeline_mode = #tpu.pipeline_mode<synchronous>, transform_indices = @transform_7, window_bounds = array<i64: 4, 128>}, {transform_indices = @transform_8, window_bounds = array<i64: 8, 128>}]} {
    %c0 = arith.constant 0 : index
    %c0_0 = arith.constant 0 : index
    %0 = vector.load %arg11[%c0, %c0_0] : memref<4x128xf32, #tpu.memory_space<vmem>>, vector<4x128xf32>
    %c0_i32 = arith.constant 0 : i32
    %1 = arith.cmpi eq, %arg1, %c0_i32 : i32
    %2 = arith.extui %1 : i1 to i32
    %c0_i32_1 = arith.constant 0 : i32
    %3 = arith.cmpi ne, %2, %c0_i32_1 : i32
    scf.if %3 {
      %cst = arith.constant 0.000000e+00 : f32
      %12 = vector.broadcast %cst : f32 to vector<8x32xf32>
      %c0_4 = arith.constant 0 : index
      %c0_5 = arith.constant 0 : index
      %13 = vector.load %arg13[%c0_4, %c0_5] : memref<8x32xf32, #tpu.memory_space<vmem>>, vector<8x32xf32>
      tpu.vector_store %arg13[%c0_4, %c0_5], %12 {strides = array<i32>} : memref<8x32xf32, #tpu.memory_space<vmem>>, vector<8x32xf32>,
      %14 = tpu.iota {dimensions = array<i32: 0>} : vector<8x128xi32>
      %c0_6 = arith.constant 0 : index
      %c0_7 = arith.constant 0 : index
      %15 = vector.load %arg14[%c0_6, %c0_7] : memref<8x128xi32, #tpu.memory_space<vmem>>, vector<8x128xi32>
      tpu.vector_store %arg14[%c0_6, %c0_7], %14 {strides = array<i32>} : memref<8x128xi32, #tpu.memory_space<vmem>>, vector<8x128xi32>,
    } else {
    }
    %4 = arith.index_cast %arg0 : i32 to index
    %5 = memref.load %arg3[%4] : memref<3xi32, #tpu.memory_space<smem>>
    %6 = arith.cmpi slt, %arg1, %5 : i32
    %7 = arith.extui %6 : i1 to i32
    %c0_i32_2 = arith.constant 0 : i32
    %8 = arith.cmpi ne, %7, %c0_i32_2 : i32
    scf.if %8 {
      %c0_4 = arith.constant 0 : index
      %c0_5 = arith.constant 0 : index
      %12 = vector.load %arg5[%c0_4, %c0_5] : memref<128x10xf32, #tpu.memory_space<vmem>>, vector<128x10xf32>
      %c0_6 = arith.constant 0 : index
      %c0_7 = arith.constant 0 : index
      %13 = vector.load %arg7[%c0_6, %c0_7] : memref<10x32xf32, #tpu.memory_space<vmem>>, vector<10x32xf32>
      %cst = arith.constant dense<0.000000e+00> : vector<128x32xf32>
      %14 = tpu.matmul %12, %13, %cst {dimension_numbers = #tpu.dot_dimension_numbers<[1], [0], [0], [1], [0, 0, 1, 1], [], []>} : vector<128x10xf32>, vector<10x32xf32>, vector<128x32xf32> -> vector<128x32xf32>
      %15 = vector.extract_strided_slice %0 {offsets = [0, 0], sizes = [1, 32], strides = [1, 1]} : vector<4x128xf32> to vector<1x32xf32>
      %16 = vector.broadcast %15 : vector<1x32xf32> to vector<128x32xf32>
      %17 = arith.addf %14, %16 : vector<128x32xf32>
      %18 = arith.negf %17 : vector<128x32xf32>
      %19 = math.exp %18 : vector<128x32xf32>
      %cst_8 = arith.constant 1.000000e+00 : f32
      %20 = vector.broadcast %cst_8 : f32 to vector<128x32xf32>
      %21 = arith.addf %20, %19 : vector<128x32xf32>
      %22 = arith.divf %20, %21 : vector<128x32xf32>
      %23 = arith.mulf %17, %22 : vector<128x32xf32>
      %c0_9 = arith.constant 0 : index
      %c0_10 = arith.constant 0 : index
      %24 = vector.load %arg8[%c0_9, %c0_10] : memref<32x32xf32, #tpu.memory_space<vmem>>, vector<32x32xf32>
      %cst_11 = arith.constant dense<0.000000e+00> : vector<128x32xf32>
      %25 = tpu.matmul %23, %24, %cst_11 {dimension_numbers = #tpu.dot_dimension_numbers<[1], [0], [0], [1], [0, 0, 1, 1], [], []>} : vector<128x32xf32>, vector<32x32xf32>, vector<128x32xf32> -> vector<128x32xf32>
      %26 = vector.extract_strided_slice %0 {offsets = [1, 0], sizes = [1, 32], strides = [1, 1]} : vector<4x128xf32> to vector<1x32xf32>
      %27 = vector.broadcast %26 : vector<1x32xf32> to vector<128x32xf32>
      %28 = arith.addf %25, %27 : vector<128x32xf32>
      %29 = arith.negf %28 : vector<128x32xf32>
      %30 = math.exp %29 : vector<128x32xf32>
      %cst_12 = arith.constant 1.000000e+00 : f32
      %31 = vector.broadcast %cst_12 : f32 to vector<128x32xf32>
      %32 = arith.addf %31, %30 : vector<128x32xf32>
      %33 = arith.divf %31, %32 : vector<128x32xf32>
      %34 = arith.mulf %28, %33 : vector<128x32xf32>
      %c0_13 = arith.constant 0 : index
      %c0_14 = arith.constant 0 : index
      %35 = vector.load %arg4[%c0_13, %c0_14] : memref<1x128xi32, #tpu.memory_space<vmem>>, vector<1x128xi32>
      %c8_i32 = arith.constant 8 : i32
      %36 = arith.muli %arg0, %c8_i32 : i32
      %37 = vector.broadcast %36 : i32 to vector<1x128xi32>
      %38 = arith.subi %35, %37 : vector<1x128xi32>
      %c0_15 = arith.constant 0 : index
      %c0_16 = arith.constant 0 : index
      %39 = vector.load %arg14[%c0_15, %c0_16] : memref<8x128xi32, #tpu.memory_space<vmem>>, vector<8x128xi32>
      %40 = vector.broadcast %38 : vector<1x128xi32> to vector<8x128xi32>
      %41 = arith.cmpi eq, %39, %40 : vector<8x128xi32>
      %42 = arith.extui %41 : vector<8x128xi1> to vector<8x128xi32>
      %43 = arith.sitofp %42 : vector<8x128xi32> to vector<8x128xf32>
      %c0_17 = arith.constant 0 : index
      %c0_18 = arith.constant 0 : index
      %44 = vector.load %arg13[%c0_17, %c0_18] : memref<8x32xf32, #tpu.memory_space<vmem>>, vector<8x32xf32>
      %cst_19 = arith.constant dense<0.000000e+00> : vector<8x32xf32>
      %45 = tpu.matmul %43, %34, %cst_19 {dimension_numbers = #tpu.dot_dimension_numbers<[1], [0], [0], [1], [0, 0, 1, 1], [], []>} : vector<8x128xf32>, vector<128x32xf32>, vector<8x32xf32> -> vector<8x32xf32>
      %46 = arith.addf %44, %45 : vector<8x32xf32>
      %c0_20 = arith.constant 0 : index
      %c0_21 = arith.constant 0 : index
      %47 = vector.load %arg13[%c0_20, %c0_21] : memref<8x32xf32, #tpu.memory_space<vmem>>, vector<8x32xf32>
      tpu.vector_store %arg13[%c0_20, %c0_21], %46 {strides = array<i32>} : memref<8x32xf32, #tpu.memory_space<vmem>>, vector<8x32xf32>,
    } else {
    }
    %c2_i32 = arith.constant 2 : i32
    %9 = arith.cmpi eq, %arg1, %c2_i32 : i32
    %10 = arith.extui %9 : i1 to i32
    %c0_i32_3 = arith.constant 0 : i32
    %11 = arith.cmpi ne, %10, %c0_i32_3 : i32
    scf.if %11 {
      %c0_4 = arith.constant 0 : index
      %c0_5 = arith.constant 0 : index
      %12 = vector.load %arg6[%c0_4, %c0_5] : memref<8x8xf32, #tpu.memory_space<vmem>>, vector<8x8xf32>
      %c0_6 = arith.constant 0 : index
      %c0_7 = arith.constant 0 : index
      %13 = vector.load %arg9[%c0_6, %c0_7] : memref<40x32xf32, #tpu.memory_space<vmem>>, vector<8x32xf32>
      %cst = arith.constant dense<0.000000e+00> : vector<8x32xf32>
      %14 = tpu.matmul %12, %13, %cst {dimension_numbers = #tpu.dot_dimension_numbers<[1], [0], [0], [1], [0, 0, 1, 1], [], []>} : vector<8x8xf32>, vector<8x32xf32>, vector<8x32xf32> -> vector<8x32xf32>
      %c0_8 = arith.constant 0 : index
      %c0_9 = arith.constant 0 : index
      %15 = vector.load %arg13[%c0_8, %c0_9] : memref<8x32xf32, #tpu.memory_space<vmem>>, vector<8x32xf32>
      %c8 = arith.constant 8 : index
      %c0_10 = arith.constant 0 : index
      %16 = vector.load %arg9[%c8, %c0_10] : memref<40x32xf32, #tpu.memory_space<vmem>>, vector<32x32xf32>
      %cst_11 = arith.constant dense<0.000000e+00> : vector<8x32xf32>
      %17 = tpu.matmul %15, %16, %cst_11 {dimension_numbers = #tpu.dot_dimension_numbers<[1], [0], [0], [1], [0, 0, 1, 1], [], []>} : vector<8x32xf32>, vector<32x32xf32>, vector<8x32xf32> -> vector<8x32xf32>
      %18 = arith.addf %14, %17 : vector<8x32xf32>
      %19 = vector.extract_strided_slice %0 {offsets = [2, 0], sizes = [1, 32], strides = [1, 1]} : vector<4x128xf32> to vector<1x32xf32>
      %20 = vector.broadcast %19 : vector<1x32xf32> to vector<8x32xf32>
      %21 = arith.addf %18, %20 : vector<8x32xf32>
      %22 = arith.negf %21 : vector<8x32xf32>
      %23 = math.exp %22 : vector<8x32xf32>
      %cst_12 = arith.constant 1.000000e+00 : f32
      %24 = vector.broadcast %cst_12 : f32 to vector<8x32xf32>
      %25 = arith.addf %24, %23 : vector<8x32xf32>
      %26 = arith.divf %24, %25 : vector<8x32xf32>
      %27 = arith.mulf %21, %26 : vector<8x32xf32>
      %c0_13 = arith.constant 0 : index
      %c0_14 = arith.constant 0 : index
      %28 = vector.load %arg10[%c0_13, %c0_14] : memref<32x128xf32, #tpu.memory_space<vmem>>, vector<32x128xf32>
      %cst_15 = arith.constant dense<0.000000e+00> : vector<8x128xf32>
      %29 = tpu.matmul %27, %28, %cst_15 {dimension_numbers = #tpu.dot_dimension_numbers<[1], [0], [0], [1], [0, 0, 1, 1], [], []>} : vector<8x32xf32>, vector<32x128xf32>, vector<8x128xf32> -> vector<8x128xf32>
      %30 = vector.extract_strided_slice %0 {offsets = [3, 0], sizes = [1, 128], strides = [1, 1]} : vector<4x128xf32> to vector<1x128xf32>
      %31 = vector.broadcast %30 : vector<1x128xf32> to vector<8x128xf32>
      %32 = arith.addf %29, %31 : vector<8x128xf32>
      %c0_16 = arith.constant 0 : index
      %c0_17 = arith.constant 0 : index
      %33 = vector.load %arg12[%c0_16, %c0_17] : memref<8x128xf32, #tpu.memory_space<vmem>>, vector<8x128xf32>
      tpu.vector_store %arg12[%c0_16, %c0_17], %32 {strides = array<i32>} : memref<8x128xf32, #tpu.memory_space<vmem>>, vector<8x128xf32>,
    } else {
    }
    return
  }
  func.func @transform_0(%arg0: i32, %arg1: i32, %arg2: memref<3xi32, #tpu.memory_space<smem>>, %arg3: memref<3xi32, #tpu.memory_space<smem>>) -> (i32, i32) {
    %0 = arith.index_cast %arg0 : i32 to index
    %1 = memref.load %arg2[%0] : memref<3xi32, #tpu.memory_space<smem>>
    %2 = arith.index_cast %arg0 : i32 to index
    %3 = memref.load %arg3[%2] : memref<3xi32, #tpu.memory_space<smem>>
    %c1_i32 = arith.constant 1 : i32
    %4 = arith.subi %3, %c1_i32 : i32
    %5 = arith.minsi %arg1, %4 : i32
    %6 = arith.addi %1, %5 : i32
    %c0_i32 = arith.constant 0 : i32
    %c0_i32_0 = arith.constant 0 : i32
    return %c0_i32, %6 : i32, i32
  }
  func.func @transform_1(%arg0: i32, %arg1: i32, %arg2: memref<3xi32, #tpu.memory_space<smem>>, %arg3: memref<3xi32, #tpu.memory_space<smem>>) -> (i32, i32) {
    %0 = arith.index_cast %arg0 : i32 to index
    %1 = memref.load %arg2[%0] : memref<3xi32, #tpu.memory_space<smem>>
    %2 = arith.index_cast %arg0 : i32 to index
    %3 = memref.load %arg3[%2] : memref<3xi32, #tpu.memory_space<smem>>
    %c1_i32 = arith.constant 1 : i32
    %4 = arith.subi %3, %c1_i32 : i32
    %5 = arith.minsi %arg1, %4 : i32
    %6 = arith.addi %1, %5 : i32
    %c0_i32 = arith.constant 0 : i32
    %c0_i32_0 = arith.constant 0 : i32
    return %6, %c0_i32 : i32, i32
  }
  func.func @transform_2(%arg0: i32, %arg1: i32, %arg2: memref<3xi32, #tpu.memory_space<smem>>, %arg3: memref<3xi32, #tpu.memory_space<smem>>) -> (i32, i32) {
    %c0_i32 = arith.constant 0 : i32
    %c0_i32_0 = arith.constant 0 : i32
    return %arg0, %c0_i32 : i32, i32
  }
  func.func @transform_3(%arg0: i32, %arg1: i32, %arg2: memref<3xi32, #tpu.memory_space<smem>>, %arg3: memref<3xi32, #tpu.memory_space<smem>>) -> (i32, i32) {
    %c0_i32 = arith.constant 0 : i32
    %c0_i32_0 = arith.constant 0 : i32
    %c0_i32_1 = arith.constant 0 : i32
    return %c0_i32, %c0_i32_0 : i32, i32
  }
  func.func @transform_4(%arg0: i32, %arg1: i32, %arg2: memref<3xi32, #tpu.memory_space<smem>>, %arg3: memref<3xi32, #tpu.memory_space<smem>>) -> (i32, i32) {
    %c0_i32 = arith.constant 0 : i32
    %c0_i32_0 = arith.constant 0 : i32
    %c0_i32_1 = arith.constant 0 : i32
    return %c0_i32, %c0_i32_0 : i32, i32
  }
  func.func @transform_5(%arg0: i32, %arg1: i32, %arg2: memref<3xi32, #tpu.memory_space<smem>>, %arg3: memref<3xi32, #tpu.memory_space<smem>>) -> (i32, i32) {
    %c0_i32 = arith.constant 0 : i32
    %c0_i32_0 = arith.constant 0 : i32
    %c0_i32_1 = arith.constant 0 : i32
    return %c0_i32, %c0_i32_0 : i32, i32
  }
  func.func @transform_6(%arg0: i32, %arg1: i32, %arg2: memref<3xi32, #tpu.memory_space<smem>>, %arg3: memref<3xi32, #tpu.memory_space<smem>>) -> (i32, i32) {
    %c0_i32 = arith.constant 0 : i32
    %c0_i32_0 = arith.constant 0 : i32
    %c0_i32_1 = arith.constant 0 : i32
    return %c0_i32, %c0_i32_0 : i32, i32
  }
  func.func @transform_7(%arg0: i32, %arg1: i32, %arg2: memref<3xi32, #tpu.memory_space<smem>>, %arg3: memref<3xi32, #tpu.memory_space<smem>>) -> (i32, i32) {
    %c0_i32 = arith.constant 0 : i32
    %c0_i32_0 = arith.constant 0 : i32
    %c0_i32_1 = arith.constant 0 : i32
    return %c0_i32, %c0_i32_0 : i32, i32
  }
  func.func @transform_8(%arg0: i32, %arg1: i32, %arg2: memref<3xi32, #tpu.memory_space<smem>>, %arg3: memref<3xi32, #tpu.memory_space<smem>>) -> (i32, i32) {
    %c0_i32 = arith.constant 0 : i32
    %c0_i32_0 = arith.constant 0 : i32
    return %arg0, %c0_i32 : i32, i32
  }
}

</mosaic_0001>

<bundles_post_ra>
// kernel: tpu_custom_call.1
= control target key start
LH: loop header
LB: loop body
LE: loop exit
PB: predicated region body
PF: predicated region fallthrough
CT: control target
= control target key end

     0   :  { %s2037_s19 = smov [#allocation5]   ;;  %s2038_s20 = smov [#allocation6]   ;;  %s2970_s0 = inlined_call_operand.vmem [shape: s32[3], index: 0, kind: input, shape index: {}]   ;;  %s2971_s2 = inlined_call_operand.vmem [shape: s32[1,640], index: 2, kind: input, shape index: {}]   ;;  %s2972_s3 = inlined_call_operand.vmem [shape: f32[640,10], index: 3, kind: input, shape index: {}]   ;;  %s2973_s4 = inlined_call_operand.vmem [shape: f32[24,8], index: 4, kind: input, shape index: {}]   ;;  %s2974_s5 = inlined_call_operand.vmem [shape: f32[10,32], index: 5, kind: input, shape index: {}]   ;;  %s2975_s6 = inlined_call_operand.vmem [shape: f32[32,32], index: 6, kind: input, shape index: {}]   ;;  %s2976_s7 = inlined_call_operand.vmem [shape: f32[40,32], index: 7, kind: input, shape index: {}]   ;;  %s2977_s8 = inlined_call_operand.vmem [shape: f32[32,128], index: 8, kind: input, shape index: {}]   ;;  %s2978_s9 = inlined_call_operand.vmem [shape: f32[4,128], index: 9, kind: input, shape index: {}]   ;;  %s2979_s10 = inlined_call_operand.hbm [shape: f32[24,128], index: 10, kind: output, shape index: {}]   ;;  %s2980_s1 = inlined_call_operand.vmem [shape: s32[3], index: 1, kind: input, shape index: {}]  }
   0x1   :  { %3005 = sst [smem:[#allocation33_spill]] %s2978_s9  ;;  %s16_s15 = sshll.u32 %s2970_s0, 4  ;;  %s17_s15 = int_to_ptr.vmem [resolvable:$true] %s16_s15 }
   0x2   :  { %s21_s18 = sshll.u32 %s2980_s1, 4  ;;  %s22_s18 = int_to_ptr.vmem [resolvable:$true] %s21_s18 }
   0x3   :  { %19 = dma.vmem_to_smem %s17_s15, 16, %s2037_s19, [#allocation4] }
   0x4   :  { %24 = dma.vmem_to_smem %s22_s18, 16, %s2038_s20, [#allocation4] }
   0x5   :  { %1999 = dma.done.wait [#allocation4], 32 }
   0x6   :  { %2000 = vsyncadd [#allocation4], 4294967264 }
   0x7   :  { %27 = sfence }
   0x8   :  { %28 = vsyncpa [#allocation8], 0 }
   0x9   :  { %30 = vsyncpa [#allocation8 + $0x1], 0  ;;  %s2102_s21 = smov 0   ;;  %s2104_s22 = smov 0  }
   0xa   :  { %s2106_s0 = smov 0   ;;  %s2108_s23 = smov 0  }
   0xb   :  { %s2110_s1 = smov 0   ;;  %s2112_s24 = smov 0  }
   0xc   :  { %s2114_s25 = smov 0   ;;  %s2116_s26 = smov 0  }
   0xd LB: > { %3006 = sst [smem:[#allocation11_spill]] %s2007_s21  ;;  %s1608_s27 = sadd.s32 4294967295, %s2035_s26   ;;  %s2035_s26 = sphi %s2116_s26, %s36_s26   ;;  %s2031_s25 = sphi %s2114_s25, %s3086_s25   ;;  %s2027_s24 = sphi %s2112_s24, %s3085_s24   ;;  %s2023_s1 = sphi %s2110_s1, %s3084_s1   ;;  %s2019_s23 = sphi %s2108_s23, %s3083_s23   ;;  %s2015_s0 = sphi %s2106_s0, %s3082_s0   ;;  %s2011_s22 = sphi %s2104_s22, %s3088_s22   ;;  %s2007_s21 = sphi %s2102_s21, %s3087_s21  }
   0xe   : > { %3007 = sst [smem:[#allocation12_spill]] %s2015_s0  ;;  %s1609_s28 = sadd.s32 4294967294, %s2035_s26  }
   0xf   : > { %3008 = sst [smem:[#allocation13_spill]] %s2027_s24  ;;  %s45_s29 = sadd.s32 1, %s2027_s24 }
  0x10   : > { %3009 = sst [smem:[#allocation14_spill]] %s2031_s25  ;;  %p46_p0 = scmp.ge.s32.totalorder %s45_s29, 3 }
  0x11   : > { %s48_s30 = sadd.s32 1, %s2031_s25  ;;  %p272_p1 = scmp.ne.s32.totalorder %s2015_s0, %s2011_s22 }
  0x12   : > { %p273_p2 = scmp.eq.s32.totalorder %s1608_s27, 8  ;;  %s3090_s29 = smov (%p46_p0, %s45_s29), 0 }
  0x13   : > { %3010 = sst [smem:[#allocation15_spill]] %s3090_s29  ;;  %s3092_s30 = smov (!%p46_p0, %s48_s30), %s2031_s25 }
  0x14   : > { %p2151_p3 = por %p273_p2, %p272_p1  ;;  %p278_p4 = scmp.ne.s32.totalorder %s2011_s22, %s2007_s21 }
  0x15   : > { %p50_p5 = scmp.ge.s32.totalorder %s3092_s30, 3  ;;  %p279_p6 = scmp.eq.s32.totalorder %s1609_s28, 8 }
  0x16   : > { %p1616_p7 = scmp.ge.s32.totalorder %s2035_s26, 1  ;;  %p358_p8 = scmp.lt.s32.totalorder %s2035_s26, 10 }
  0x17   : > { %s3094_s30 = smov (%p50_p5, %s3092_s30), 0  ;;  %p2161_p9 = por %p279_p6, %p278_p4 }
  0x18   : > { %3012 = sst [smem:[#allocation16_spill]] %s3094_s30  ;;  %p359_p10 = pnand %p1616_p7, %p358_p8 }
  0x19   : > { %s3013_s12 = scalar_select %p2161_p9, 1, 0 }
  0x1a   : > { %s259_s13 = ssub.s32 %s2031_s25, %s3094_s30  ;;  %s262_s14 = sadd.s32 1, %s2015_s0 }
  0x1b   : > { %3014 = sst [smem:[#allocation17_spill]] %s3013_s12  ;;  %p260_p11 = scmp.eq.s32.totalorder %s259_s13, 0 }
  0x1c   : > { %362 = sbr.rel (%p359_p10) target bundleno = 1009 (0x3f1), region = 52 }
  0x1d   : > { %s2169_s15 = scalar_select %p260_p11, %s2015_s0, %s262_s14  }
  0x1f   : > { %3015 = sst [smem:[#allocation18_spill]] %s2169_s15 }
  0x21   : > { %s2984_s16 = sand.u32 1, %s2011_s22   ;;  %s3016_s9 = sld [smem:[#allocation33_spill]] }
  0x22   : > { %s2179_s19 = sshll.u32 %s2984_s16, 3  ;;  %s412_s20 = sld [smem:[#allocation6 + %s2023_s1]] }
  0x23   : > { %s427_s27 = sld [smem:[#allocation6 + %s2023_s1]]  ;;  %p444_p12 = scmp.lt.s32.totalorder %s2023_s1, 2 }
  0x24   : > { %s411_s28 = sld [smem:[#allocation5 + %s2023_s1]]  ;;  %p1623_p4 = scmp.ne.s32.totalorder %s2019_s23, 0 }
  0x25   : > { %s445_s13 = scalar_select %p444_p12, %s2023_s1, 2 }
  0x26   : > { %s426_s14 = sld [smem:[#allocation5 + %s2023_s1]] }
  0x27   : > { %v2175_v0 = vld [vmem:[%s3016_s9] sm:$0xf]  ;;  %s1622_s29 = sshll.u32 %s445_s13, 3 }
  0x28   : > { %3017 = vst [vmem:[#allocation19_spill] sm:$0xff] %v2175_v0  ;;  %s1618_s30 = sadd.s32 4294967295, %s412_s20  ;;  %s2191_s17 = scalar_lea.vmem %s2973_s4, %s1622_s29 }
  0x29   : > { %p414_p13 = scmp.lt.s32.totalorder %s2019_s23, %s1618_s30  ;;  %s1619_s18 = sadd.s32 4294967295, %s427_s27 }
  0x2a   : > { %p429_p0 = scmp.lt.s32.totalorder %s2019_s23, %s1619_s18 }
  0x2b   : > { %s415_s9 = scalar_select %p414_p13, %s2019_s23, %s1618_s30 }
  0x2c   : > { %s430_s15 = scalar_select %p429_p0, %s2019_s23, %s1619_s18 }
  0x2d   : > { %s416_s16 = sadd.s32 %s415_s9, %s411_s28  ;;  %s410_s9 = scalar_lea.vmem [#allocation7], %s2179_s19 }
  0x2e   : > { %p417_p1 = scmp.lt.s32.totalorder %s416_s16, 4  ;;  %s431_s0 = sadd.s32 %s430_s15, %s426_s14 }
  0x2f   : > { %s1620_s21 = sshll.u32 %s431_s0, 4 }
  0x30   : > { %s3096_s16 = smov (!%p417_p1, %s416_s16), 4  ;;  %p433_p2 = scmp.lt.s32.totalorder %s1620_s21, 79 }
  0x31   : > { %s419_s13 = scalar_lea.vmem %s2971_s2, %s3096_s16  ;;  %452 = sbr.rel (%p1623_p4) target bundleno = 59 (0x3b), region = 56 }
  0x32   : > { %s3098_s21 = smov (!%p433_p2, %s1620_s21), 79 }
  0x33   : > { %s1621_s24 = sshll.u32 %s3098_s21, 3 }
  0x34   : > { %s2205_s30 = scalar_lea.vmem %s2972_s3, %s1621_s24 }
  0x36   : > { %vm453_vm0 = vcmask 261120   ;;  %v455_v1 = vlaneseq  ;;  %v2039_v2 = vmov 0.0  }
  0x37   : > { %454 = vst.msk [vmem:[#allocation2] sm:$0xff] %vm453_vm0, %v2039_v2 }
  0x38   : > { %v456_v3 = vshrl.u32 %v455_v1, 7 }
  0x3a   : > { %457 = vst [vmem:[#allocation3] sm:$0xff] %v456_v3 }
  0x3b PF: > { %s458_s0 = sld [smem:[#allocation6 + %s2023_s1]] }
  0x41   : > { %p1624_p5 = scmp.ge.s32.totalorder %s2019_s23, %s458_s0 }
  0x43   : > { %462 = sbr.rel (%p1624_p5) target bundleno = 684 (0x2ac), region = 60 }
  0x48   : > { %v480_v4 = vld [vmem:[%s2974_s5 + $0x8] sm:$0x3]  ;;  %vm531_vm1 = vcmask 1041408   ;;  %v479_v5 = vld [vmem:[%s2974_s5] sm:$0xff]  ;;  %vm482_vm2 = vcmask 80896   ;;  %v473_v9 = vld [vmem:[%s2205_s30 + $0x50] sm:$0xff] }
  0x49   : > { %1625 = vmatpush.msk.msra.mxu0 %vm531_vm1, %v480_v4  ;;  %v463_v6 = vld [vmem:[%s2205_s30] sm:$0xff]  ;;  %1702 = vmatpush.msk.msra.mxu2 %vm531_vm1, %v480_v4  ;;  %v472_v7 = vld [vmem:[%s2205_s30 + $0x48] sm:$0xff]  ;;  %v465_v10 = vld [vmem:[%s2205_s30 + $0x10] sm:$0xff]  ;;  %v2256_v24 = vperm.slane %v2175_v0, 0  ;;  %vm3004_vm7 = vcmask 261120   ;;  %s1690_s0 = sshll.u32 %s2023_s1, 3 }
  0x4a   : > { %v464_v8 = vld [vmem:[%s2205_s30 + $0x8] sm:$0xff]  ;;  %v474_v11 = vld [vmem:[%s2205_s30 + $0x58] sm:$0xff]  ;;  %v475_v13 = vld [vmem:[%s2205_s30 + $0x60] sm:$0xff] }
  0x4b   : > { %550 = vmatpush.msra.mxu0 %v479_v5  ;;  %1703 = vmatpush.msra.mxu2 %v479_v5  ;;  %v466_v12 = vld [vmem:[%s2205_s30 + $0x18] sm:$0xff]  ;;  %v467_v14 = vld [vmem:[%s2205_s30 + $0x20] sm:$0xff]  ;;  %v476_v15 = vld [vmem:[%s2205_s30 + $0x68] sm:$0xff] }
  0x4c   : > { %1626 = vmatmul.msk.f32.vlgmr.msra.gmra.mxu0 %vm482_vm2, %v463_v6  ;;  %1635 = vmatmul.msk.f32.vlgmr.msra.gmra.mxu2 %vm482_vm2, %v472_v7  ;;  %v468_v16 = vld [vmem:[%s2205_s30 + $0x28] sm:$0xff]  ;;  %v477_v17 = vld [vmem:[%s2205_s30 + $0x70] sm:$0xff]  ;;  %v478_v19 = vld [vmem:[%s2205_s30 + $0x78] sm:$0xff] }
  0x4d   : > { %v469_v18 = vld [vmem:[%s2205_s30 + $0x30] sm:$0xff]  ;;  %v470_v20 = vld [vmem:[%s2205_s30 + $0x38] sm:$0xff]  ;;  %v471_v21 = vld [vmem:[%s2205_s30 + $0x40] sm:$0xff] }
  0x4e   : > { %v923_v22 = vld [vmem:[%s2975_s6 + $0x18] sm:$0xff]  ;;  %v922_v23 = vld [vmem:[%s2975_s6 + $0x10] sm:$0xff]  ;;  %v921_v25 = vld [vmem:[%s2975_s6 + $0x8] sm:$0xff] }
  0x4f   : > { %986 = vmatpush.msra.mxu1 %v923_v22  ;;  %1704 = vmatpush.msra.mxu3 %v923_v22  ;;  %v920_v27 = vld [vmem:[%s2975_s6] sm:$0xff] }
  0x51   : > { %987 = vmatpush.msra.mxu1 %v922_v23  ;;  %1705 = vmatpush.msra.mxu3 %v922_v23 }
  0x53   : > { %988 = vmatpush.msra.mxu1 %v921_v25  ;;  %1706 = vmatpush.msra.mxu3 %v921_v25 }
  0x54   : > { %1627 = vmatmul.msk.f32.gmra.mxu0 %vm482_vm2, %v464_v8  ;;  %1636 = vmatmul.msk.f32.gmra.mxu2 %vm482_vm2, %v473_v9 }
  0x55   : > { %989 = vmatpush.msra.mxu1 %v920_v27  ;;  %1707 = vmatpush.msra.mxu3 %v920_v27 }
  0x5c   : > { %1628 = vmatmul.msk.f32.gmra.mxu0 %vm482_vm2, %v465_v10  ;;  %1637 = vmatmul.msk.f32.gmra.mxu2 %vm482_vm2, %v474_v11 }
  0x64   : > { %1629 = vmatmul.msk.f32.gmra.mxu0 %vm482_vm2, %v466_v12  ;;  %1638 = vmatmul.msk.f32.gmra.mxu2 %vm482_vm2, %v475_v13 }
  0x6c   : > { %1630 = vmatmul.msk.f32.gmra.mxu0 %vm482_vm2, %v467_v14  ;;  %1639 = vmatmul.msk.f32.gmra.mxu2 %vm482_vm2, %v476_v15 }
  0x74   : > { %1631 = vmatmul.msk.f32.gmra.mxu0 %vm482_vm2, %v468_v16  ;;  %1640 = vmatmul.msk.f32.gmra.mxu2 %vm482_vm2, %v477_v17 }
  0x7c   : > { %1632 = vmatmul.msk.f32.gmra.mxu0 %vm482_vm2, %v469_v18  ;;  %1641 = vmatmul.msk.f32.gmra.mxu2 %vm482_vm2, %v478_v19 }
  0x84   : > { %1633 = vmatmul.msk.f32.gmra.mxu0 %vm482_vm2, %v470_v20 }
  0x8c   : > { %1634 = vmatmul.msk.f32.gmra.mxu0 %vm482_vm2, %v471_v21 }
  0xc9   : > { %v552_v26 = vpop.f32.mrf.mxu0 }
  0xca   : > { %v553_v28 = vadd.f32 %v552_v26, %v2256_v24 }
  0xcc   : > { %v1642_v29 = vmul.f32 -1.442695, %v553_v28 }
  0xce   : > { %1783 = vpow2.f32 %v1642_v29 }
  0xcf   : > { %v579_v7 = vpop.f32.mrf.mxu2 }
  0xd1   : > { %v555_v30 = vpop.f32.mrf.mxu0 }
  0xd2   : > { %v556_v31 = vadd.f32 %v555_v30, %v2256_v24 }
  0xd4   : > { %v1784_v32 = vpop.eup %1783  ;;  %v1643_v33 = vmul.f32 -1.442695, %v556_v31 }
  0xd5   : > { %v648_v34 = vadd.f32 1.0, %v1784_v32  ;;  %v2286_v32 = vadd.f32 %v579_v7, %v2256_v24 }
  0xd6   : > { %1785 = vpow2.f32 %v1643_v33 }
  0xd7   : > { %1787 = vrcp.f32 %v648_v34  ;;  %v675_v43 = vand.u32 2147483648, %v648_v34  ;;  %v673_v46 = vand.u32 2147483647, %v648_v34  ;;  %vm669_vm4 = vweird.f32 %v648_v34 }
  0xd9   : > { %v558_v35 = vpop.f32.mrf.mxu0  ;;  %v676_v52 = vor.u32 1.1754944e-38, %v675_v43  ;;  %vm674_vm6 = vcmp.eq.f32.partialorder %v673_v46, 8.507059e+37  ;;  %v1651_v43 = vmul.f32 -1.442695, %v2286_v32 }
  0xda   : > { %v2267_v36 = vadd.f32 %v558_v35, %v2256_v24 }
  0xdc   : > { %v1786_v37 = vpop.eup %1785  ;;  %v1644_v38 = vmul.f32 -1.442695, %v2267_v36 }
  0xdd   : > { %v1788_v39 = vpop.eup %1787  ;;  %v649_v40 = vadd.f32 1.0, %v1786_v37 }
  0xde   : > { %v665_v41 = vmul.f32 %v1788_v39, %v648_v34  ;;  %1789 = vpow2.f32 %v1644_v38  ;;  %vm670_vm3 = vweird.f32 %v1788_v39 }
  0xdf   : > { %1791 = vrcp.f32 %v649_v40  ;;  %vm671_vm5 = vmor %vm669_vm4, %vm670_vm3  ;;  %v690_v59 = vand.u32 2147483648, %v649_v40  ;;  %v688_v62 = vand.u32 2147483647, %v649_v40  ;;  %vm684_vm9 = vweird.f32 %v649_v40 }
  0xe0   : > { %v666_v42 = vsub.f32 1.0, %v665_v41 }
  0xe1   : > { %v561_v44 = vpop.f32.mrf.mxu0  ;;  %v691_v5 = vor.u32 1.1754944e-38, %v690_v59  ;;  %vm689_vm11 = vcmp.eq.f32.partialorder %v688_v62, 8.507059e+37 }
  0xe2   : > { %v667_v45 = vmul.f32 %v1788_v39, %v666_v42  ;;  %v2271_v47 = vadd.f32 %v561_v44, %v2256_v24 }
  0xe4   : > { %v1790_v48 = vpop.eup %1789  ;;  %v668_v49 = vadd.f32 %v1788_v39, %v667_v45  ;;  %v1645_v50 = vmul.f32 -1.442695, %v2271_v47 }
  0xe5   : > { %v1792_v51 = vpop.eup %1791  ;;  %v650_v53 = vadd.f32 1.0, %v1790_v48 }
  0xe6   : > { %v672_v54 = vsel %vm671_vm5, %v1788_v39, %v668_v49  ;;  %v680_v55 = vmul.f32 %v1792_v51, %v649_v40  ;;  %1793 = vpow2.f32 %v1645_v50  ;;  %vm685_vm8 = vweird.f32 %v1792_v51 }
  0xe7   : > { %v677_v56 = vsel %vm674_vm6, %v676_v52, %v672_v54  ;;  %1795 = vrcp.f32 %v650_v53  ;;  %vm686_vm10 = vmor %vm684_vm9, %vm685_vm8  ;;  %v705_v13 = vand.u32 2147483648, %v650_v53  ;;  %v703_v16 = vand.u32 2147483647, %v650_v53 }
  0xe8   : > { %v904_v57 = vmul.f32 %v677_v56, %v553_v28  ;;  %v681_v58 = vsub.f32 1.0, %v680_v55  ;;  %vm699_vm13 = vweird.f32 %v650_v53  ;;  %v582_v28 = vpop.f32.mrf.mxu2 }
  0xe9   : > { %v564_v60 = vpop.f32.mrf.mxu0  ;;  %v706_v22 = vor.u32 1.1754944e-38, %v705_v13  ;;  %vm704_vm15 = vcmp.eq.f32.partialorder %v703_v16, 8.507059e+37  ;;  %v2300_v56 = vadd.f32 %v582_v28, %v2256_v24 }
  0xea   : > { %v682_v61 = vmul.f32 %v1792_v51, %v681_v58  ;;  %v2275_v63 = vadd.f32 %v564_v60, %v2256_v24  ;;  %1658 = vmatmul.msk.f32.vlgmr.msra.gmra.mxu1 %vm3004_vm7, %v904_v57 }
  0xec   : > { %v1794_v1 = vpop.eup %1793  ;;  %v683_v2 = vadd.f32 %v1792_v51, %v682_v61  ;;  %v1646_v3 = vmul.f32 -1.442695, %v2275_v63 }
  0xed   : > { %v1796_v4 = vpop.eup %1795  ;;  %v651_v6 = vadd.f32 1.0, %v1794_v1 }
  0xee   : > { %v687_v8 = vsel %vm686_vm10, %v1792_v51, %v683_v2  ;;  %v695_v9 = vmul.f32 %v1796_v4, %v650_v53  ;;  %1797 = vpow2.f32 %v1646_v3  ;;  %vm700_vm12 = vweird.f32 %v1796_v4 }
  0xef   : > { %v692_v10 = vsel %vm689_vm11, %v691_v5, %v687_v8  ;;  %1799 = vrcp.f32 %v651_v6  ;;  %vm701_vm14 = vmor %vm699_vm13, %vm700_vm12  ;;  %v718_v35 = vand.u32 2147483647, %v651_v6  ;;  %vm714_vm1 = vweird.f32 %v651_v6 }
  0xf0   : > { %v905_v11 = vmul.f32 %v692_v10, %v556_v31  ;;  %v696_v12 = vsub.f32 1.0, %v695_v9  ;;  %v720_v31 = vand.u32 2147483648, %v651_v6  ;;  %v585_v52 = vpop.f32.mrf.mxu2 }
  0xf1   : > { %v567_v14 = vpop.f32.mrf.mxu0  ;;  %vm719_vm3 = vcmp.eq.f32.partialorder %v718_v35, 8.507059e+37 }
  0xf2   : > { %v697_v15 = vmul.f32 %v1796_v4, %v696_v12  ;;  %v2280_v17 = vadd.f32 %v567_v14, %v2256_v24  ;;  %1659 = vmatmul.msk.f32.gmra.mxu1 %vm3004_vm7, %v905_v11  ;;  %v721_v41 = vor.u32 1.1754944e-38, %v720_v31 }
  0xf4   : > { %v1798_v18 = vpop.eup %1797  ;;  %v698_v19 = vadd.f32 %v1796_v4, %v697_v15  ;;  %v1647_v20 = vmul.f32 -1.442695, %v2280_v17 }
  0xf5   : > { %v1800_v21 = vpop.eup %1799  ;;  %v652_v23 = vadd.f32 1.0, %v1798_v18 }
  0xf6   : > { %v702_v25 = vsel %vm701_vm14, %v1796_v4, %v698_v19  ;;  %v710_v26 = vmul.f32 %v1800_v21, %v651_v6  ;;  %1801 = vpow2.f32 %v1647_v20  ;;  %vm715_vm0 = vweird.f32 %v1800_v21 }
  0xf7   : > { %v707_v27 = vsel %vm704_vm15, %v706_v22, %v702_v25  ;;  %1803 = vrcp.f32 %v652_v23  ;;  %vm716_vm2 = vmor %vm714_vm1, %vm715_vm0  ;;  %v735_v50 = vand.u32 2147483648, %v652_v23  ;;  %v733_v54 = vand.u32 2147483647, %v652_v23 }
  0xf8   : > { %v906_v29 = vmul.f32 %v707_v27, %v2267_v36  ;;  %v711_v30 = vsub.f32 1.0, %v710_v26  ;;  %vm729_vm5 = vweird.f32 %v652_v23  ;;  %v1652_v4 = vmul.f32 -1.442695, %v2300_v56  ;;  %v588_v13 = vpop.f32.mrf.mxu2 }
  0xf9   : > { %v570_v33 = vpop.f32.mrf.mxu0  ;;  %v736_v60 = vor.u32 1.1754944e-38, %v735_v50  ;;  %vm734_vm8 = vcmp.eq.f32.partialorder %v733_v54, 8.507059e+37  ;;  %v2320_v35 = vadd.f32 %v588_v13, %v2256_v24 }
  0xfa   : > { %v712_v34 = vmul.f32 %v1800_v21, %v711_v30  ;;  %v2289_v37 = vadd.f32 %v570_v33, %v2256_v24  ;;  %1660 = vmatmul.msk.f32.gmra.mxu1 %vm3004_vm7, %v906_v29 }
  0xfc   : > { %v1802_v38 = vpop.eup %1801  ;;  %v713_v39 = vadd.f32 %v1800_v21, %v712_v34  ;;  %v1648_v40 = vmul.f32 -1.442695, %v2289_v37 }
  0xfd   : > { %v1804_v36 = vpop.eup %1803  ;;  %v653_v42 = vadd.f32 1.0, %v1802_v38 }
  0xfe   : > { %v717_v44 = vsel %vm716_vm2, %v1800_v21, %v713_v39  ;;  %v725_v45 = vmul.f32 %v1804_v36, %v652_v23  ;;  %1805 = vpow2.f32 %v1648_v40  ;;  %vm730_vm4 = vweird.f32 %v1804_v36 }
  0xff   : > { %v722_v46 = vsel %vm719_vm3, %v721_v41, %v717_v44  ;;  %1807 = vrcp.f32 %v653_v42  ;;  %vm731_vm6 = vmor %vm729_vm5, %vm730_vm4  ;;  %v750_v7 = vand.u32 2147483648, %v653_v42  ;;  %v748_v10 = vand.u32 2147483647, %v653_v42 }
 0x100   : > { %v907_v48 = vmul.f32 %v722_v46, %v2271_v47  ;;  %v726_v49 = vsub.f32 1.0, %v725_v45  ;;  %1809 = vpow2.f32 %v1651_v43  ;;  %vm744_vm10 = vweird.f32 %v653_v42 }
 0x101   : > { %v573_v51 = vpop.f32.mrf.mxu0  ;;  %v751_v19 = vor.u32 1.1754944e-38, %v750_v7  ;;  %vm749_vm12 = vcmp.eq.f32.partialorder %v748_v10, 8.507059e+37 }
 0x102   : > { %v727_v53 = vmul.f32 %v1804_v36, %v726_v49  ;;  %v2296_v55 = vadd.f32 %v573_v51, %v2256_v24  ;;  %1661 = vmatmul.msk.f32.gmra.mxu1 %vm3004_vm7, %v907_v48  ;;  %v1654_v48 = vmul.f32 -1.442695, %v2320_v35 }
 0x104   : > { %v1806_v57 = vpop.eup %1805  ;;  %v728_v58 = vadd.f32 %v1804_v36, %v727_v53  ;;  %v1649_v47 = vmul.f32 -1.442695, %v2296_v55 }
 0x105   : > { %v1808_v59 = vpop.eup %1807  ;;  %v654_v61 = vadd.f32 1.0, %v1806_v57 }
 0x106   : > { %v732_v62 = vsel %vm731_vm6, %v1804_v36, %v728_v58  ;;  %v740_v1 = vmul.f32 %v1808_v59, %v653_v42  ;;  %1811 = vpow2.f32 %v1649_v47  ;;  %v1810_v2 = vpop.eup %1809  ;;  %vm745_vm9 = vweird.f32 %v1808_v59  ;;  %v591_v36 = vpop.f32.mrf.mxu2 }
 0x107   : > { %v737_v3 = vsel %vm734_vm8, %v736_v60, %v732_v62  ;;  %1813 = vrcp.f32 %v654_v61  ;;  %v2309_v12 = vadd.f32 1.0, %v1810_v2  ;;  %vm746_vm11 = vmor %vm744_vm10, %vm745_vm9  ;;  %v765_v29 = vand.u32 2147483648, %v654_v61 }
 0x108   : > { %v908_v5 = vmul.f32 %v737_v3, %v2275_v63  ;;  %v741_v6 = vsub.f32 1.0, %v740_v1  ;;  %1815 = vpow2.f32 %v1652_v4  ;;  %v2312_v63 = vadd.f32 %v585_v52, %v2256_v24 }
 0x109   : > { %v576_v8 = vpop.f32.mrf.mxu0  ;;  %v763_v31 = vand.u32 2147483647, %v654_v61  ;;  %vm759_vm14 = vweird.f32 %v654_v61  ;;  %v766_v38 = vor.u32 1.1754944e-38, %v765_v29  ;;  %vm804_vm6 = vweird.f32 %v2309_v12 }
 0x10a   : > { %v742_v9 = vmul.f32 %v1808_v59, %v741_v6  ;;  %v2306_v11 = vadd.f32 %v576_v8, %v2256_v24  ;;  %1662 = vmatmul.msk.f32.gmra.mxu1 %vm3004_vm7, %v908_v5  ;;  %v1653_v27 = vmul.f32 -1.442695, %v2312_v63 }
 0x10b   : > { %vm764_vm0 = vcmp.eq.f32.partialorder %v763_v31, 8.507059e+37 }
 0x10c   : > { %v1812_v14 = vpop.eup %1811  ;;  %v743_v15 = vadd.f32 %v1808_v59, %v742_v9  ;;  %v1650_v16 = vmul.f32 -1.442695, %v2306_v11 }
 0x10d   : > { %v1814_v18 = vpop.eup %1813  ;;  %v655_v20 = vadd.f32 1.0, %v1812_v14 }
 0x10e   : > { %v747_v21 = vsel %vm746_vm11, %v1808_v59, %v743_v15  ;;  %v755_v22 = vmul.f32 %v1814_v18, %v654_v61  ;;  %1817 = vpow2.f32 %v1650_v16  ;;  %v1816_v28 = vpop.eup %1815  ;;  %vm760_vm13 = vweird.f32 %v1814_v18  ;;  %v594_v2 = vpop.f32.mrf.mxu2 }
 0x10f   : > { %v752_v23 = vsel %vm749_vm12, %v751_v19, %v747_v21  ;;  %1819 = vrcp.f32 %v655_v20  ;;  %vm761_vm15 = vmor %vm759_vm14, %vm760_vm13  ;;  %v2322_v39 = vadd.f32 1.0, %v1816_v28  ;;  %v780_v50 = vand.u32 2147483648, %v655_v20 }
 0x110   : > { %v909_v25 = vmul.f32 %v752_v23, %v2280_v17  ;;  %1821 = vrcp.f32 %v2309_v12  ;;  %v756_v26 = vsub.f32 1.0, %v755_v22  ;;  %v778_v53 = vand.u32 2147483647, %v655_v20 }
 0x111   : > { %1823 = vpow2.f32 %v1653_v27  ;;  %vm774_vm2 = vweird.f32 %v655_v20  ;;  %v781_v47 = vor.u32 1.1754944e-38, %v780_v50  ;;  %v2349_v14 = vadd.f32 %v594_v2, %v2256_v24 }
 0x112   : > { %v757_v30 = vmul.f32 %v1814_v18, %v756_v26  ;;  %1663 = vmatmul.msk.f32.gmra.mxu1 %vm3004_vm7, %v909_v25  ;;  %vm779_vm4 = vcmp.eq.f32.partialorder %v778_v53, 8.507059e+37  ;;  %v808_v15 = vand.u32 2147483647, %v2309_v12  ;;  %v810_v16 = vand.u32 2147483648, %v2309_v12 }
 0x113   : > { %v1656_v28 = vmul.f32 -1.442695, %v2349_v14  ;;  %vm819_vm14 = vweird.f32 %v2322_v39 }
 0x114   : > { %v1818_v33 = vpop.eup %1817  ;;  %v758_v34 = vadd.f32 %v1814_v18, %v757_v30  ;;  %v811_v29 = vor.u32 1.1754944e-38, %v810_v16  ;;  %vm809_vm13 = vcmp.eq.f32.partialorder %v808_v15, 8.507059e+37 }
 0x115   : > { %v1820_v17 = vpop.eup %1819  ;;  %v656_v40 = vadd.f32 1.0, %v1818_v33 }
 0x116   : > { %v2324_v41 = vpop.eup %1821  ;;  %v762_v42 = vsel %vm761_vm15, %v1814_v18, %v758_v34  ;;  %v770_v43 = vmul.f32 %v1820_v17, %v655_v20  ;;  %vm775_vm1 = vweird.f32 %v1820_v17  ;;  %v597_v30 = vpop.f32.mrf.mxu2 }
 0x117   : > { %v767_v44 = vsel %vm764_vm0, %v766_v38, %v762_v42  ;;  %1825 = vrcp.f32 %v656_v40  ;;  %v800_v49 = vmul.f32 %v2324_v41, %v2309_v12  ;;  %v1824_v51 = vpop.eup %1823  ;;  %vm776_vm3 = vmor %vm774_vm2, %vm775_vm1  ;;  %v795_v7 = vand.u32 2147483648, %v656_v40 }
 0x118   : > { %v910_v45 = vmul.f32 %v767_v44, %v2289_v37  ;;  %v771_v46 = vsub.f32 1.0, %v770_v43  ;;  %1827 = vrcp.f32 %v2322_v39  ;;  %v2333_v37 = vadd.f32 %v591_v36, %v2256_v24 }
 0x119   : > { %1829 = vpow2.f32 %v1654_v48  ;;  %v801_v58 = vsub.f32 1.0, %v800_v49  ;;  %v2335_v59 = vadd.f32 1.0, %v1824_v51  ;;  %v793_v13 = vand.u32 2147483647, %v656_v40 }
 0x11a   : > { %v772_v52 = vmul.f32 %v1820_v17, %v771_v46  ;;  %1664 = vmatmul.msk.f32.gmra.mxu1 %vm3004_vm7, %v910_v45  ;;  %v1655_v5 = vmul.f32 -1.442695, %v2333_v37  ;;  %vm805_vm8 = vweird.f32 %v2324_v41  ;;  %vm789_vm9 = vweird.f32 %v656_v40 }
 0x11b   : > { %v802_v6 = vmul.f32 %v2324_v41, %v801_v58  ;;  %1831 = vrcp.f32 %v2335_v59  ;;  %v796_v18 = vor.u32 1.1754944e-38, %v795_v7  ;;  %vm794_vm11 = vcmp.eq.f32.partialorder %v793_v13, 8.507059e+37  ;;  %vm2360_vm12 = vmor %vm804_vm6, %vm805_vm8 }
 0x11c   : > { %v773_v54 = vadd.f32 %v1820_v17, %v772_v52  ;;  %1833 = vpow2.f32 %v1655_v5  ;;  %v825_v38 = vand.u32 2147483648, %v2322_v39  ;;  %vm834_vm2 = vweird.f32 %v2335_v59 }
 0x11d   : > { %v1826_v57 = vpop.eup %1825  ;;  %v803_v20 = vadd.f32 %v2324_v41, %v802_v6  ;;  %v838_v53 = vand.u32 2147483647, %v2335_v59 }
 0x11e   : > { %v777_v60 = vsel %vm776_vm3, %v1820_v17, %v773_v54  ;;  %v785_v61 = vmul.f32 %v1826_v57, %v656_v40  ;;  %v2337_v62 = vpop.eup %1827  ;;  %vm790_vm5 = vweird.f32 %v1826_v57  ;;  %v826_v46 = vor.u32 1.1754944e-38, %v825_v38 }
 0x11f   : > { %v782_v1 = vsel %vm779_vm4, %v781_v47, %v777_v60  ;;  %v1830_v8 = vpop.eup %1829  ;;  %v815_v9 = vmul.f32 %v2337_v62, %v2322_v39  ;;  %vm791_vm10 = vmor %vm789_vm9, %vm790_vm5  ;;  %v807_v33 = vsel %vm2360_vm12, %v2324_v41, %v803_v20  ;;  %vm820_vm15 = vweird.f32 %v2337_v62 }
 0x120   : > { %v911_v3 = vmul.f32 %v782_v1, %v2296_v55  ;;  %v786_v4 = vsub.f32 1.0, %v785_v61  ;;  %v2353_v19 = vadd.f32 1.0, %v1830_v8  ;;  %v812_v17 = vsel %vm809_vm13, %v811_v29, %v807_v33  ;;  %vm821_vm0 = vmor %vm819_vm14, %vm820_vm15 }
 0x121   : > { %v816_v21 = vsub.f32 1.0, %v815_v9  ;;  %v1832_v23 = vpop.eup %1831  ;;  %v823_v41 = vand.u32 2147483647, %v2322_v39  ;;  %v913_v44 = vmul.f32 %v812_v17, %v2286_v32  ;;  %v840_v32 = vand.u32 2147483648, %v2335_v59 }
 0x122   : > { %v787_v10 = vmul.f32 %v1826_v57, %v786_v4  ;;  %1665 = vmatmul.msk.f32.gmra.mxu1 %vm3004_vm7, %v911_v3  ;;  %1835 = vrcp.f32 %v2353_v19  ;;  %v1834_v31 = vpop.eup %1833  ;;  %v830_v34 = vmul.f32 %v1832_v23, %v2335_v59  ;;  %vm835_vm3 = vweird.f32 %v1832_v23 }
 0x123   : > { %v817_v12 = vmul.f32 %v2337_v62, %v816_v21  ;;  %1837 = vpow2.f32 %v1656_v28  ;;  %v2379_v40 = vadd.f32 1.0, %v1834_v31  ;;  %vm824_vm1 = vcmp.eq.f32.partialorder %v823_v41, 8.507059e+37  ;;  %vm836_vm4 = vmor %vm834_vm2, %vm835_vm3 }
 0x124   : > { %v788_v55 = vadd.f32 %v1826_v57, %v787_v10  ;;  %v831_v42 = vsub.f32 1.0, %v830_v34  ;;  %v841_v47 = vor.u32 1.1754944e-38, %v840_v32  ;;  %vm839_vm5 = vcmp.eq.f32.partialorder %v838_v53, 8.507059e+37 }
 0x125   : > { %v818_v36 = vadd.f32 %v2337_v62, %v817_v12  ;;  %1839 = vrcp.f32 %v2379_v40  ;;  %vm849_vm6 = vweird.f32 %v2353_v19  ;;  %v855_v59 = vand.u32 2147483648, %v2353_v19 }
 0x126   : > { %v792_v22 = vsel %vm791_vm10, %v1826_v57, %v788_v55  ;;  %v832_v49 = vmul.f32 %v1832_v23, %v831_v42  ;;  %v870_v15 = vand.u32 2147483648, %v2379_v40 }
 0x127   : > { %v797_v26 = vsel %vm794_vm11, %v796_v18, %v792_v22  ;;  %v822_v48 = vsel %vm821_vm0, %v2337_v62, %v818_v36  ;;  %v856_v8 = vor.u32 1.1754944e-38, %v855_v59  ;;  %vm864_vm11 = vweird.f32 %v2379_v40 }
 0x128   : > { %v912_v27 = vmul.f32 %v797_v26, %v2306_v11  ;;  %v2376_v11 = vadd.f32 %v597_v30, %v2256_v24  ;;  %v1836_v43 = vpop.eup %1835  ;;  %v827_v39 = vsel %vm824_vm1, %v826_v46, %v822_v48  ;;  %v833_v52 = vadd.f32 %v1832_v23, %v832_v49 }
 0x129   : > { %v1838_v24 = vpop.eup %1837  ;;  %v845_v50 = vmul.f32 %v1836_v43, %v2353_v19  ;;  %v914_v58 = vmul.f32 %v827_v39, %v2300_v56  ;;  %vm850_vm8 = vweird.f32 %v1836_v43  ;;  %v853_v56 = vand.u32 2147483647, %v2353_v19 }
 0x12a   : > { %1666 = vmatmul.msk.f32.vlgmr.msra.gmra.mxu3 %vm3004_vm7, %v912_v27  ;;  %v1657_v45 = vmul.f32 -1.442695, %v2376_v11  ;;  %v662_v51 = vadd.f32 1.0, %v1838_v24  ;;  %v837_v61 = vsel %vm836_vm4, %v1832_v23, %v833_v52  ;;  %vm851_vm9 = vmor %vm849_vm6, %vm850_vm8  ;;  %v868_v18 = vand.u32 2147483647, %v2379_v40 }
 0x12b   : > { %v846_v54 = vsub.f32 1.0, %v845_v50  ;;  %v1840_v57 = vpop.eup %1839  ;;  %v842_v2 = vsel %vm839_vm5, %v841_v47, %v837_v61  ;;  %vm854_vm10 = vcmp.eq.f32.partialorder %v853_v56, 8.507059e+37  ;;  %v871_v21 = vor.u32 1.1754944e-38, %v870_v15 }
 0x12c   : > { %1841 = vpow2.f32 %v1657_v45  ;;  %v860_v1 = vmul.f32 %v1840_v57, %v2379_v40  ;;  %v915_v7 = vmul.f32 %v842_v2, %v2312_v63  ;;  %vm865_vm12 = vweird.f32 %v1840_v57 }
 0x12d   : > { %1843 = vrcp.f32 %v662_v51  ;;  %v847_v62 = vmul.f32 %v1836_v43, %v846_v54  ;;  %vm866_vm13 = vmor %vm864_vm11, %vm865_vm12  ;;  %vm869_vm14 = vcmp.eq.f32.partialorder %v868_v18, 8.507059e+37  ;;  %vm879_vm15 = vweird.f32 %v662_v51 }
 0x12e   : > { %v861_v5 = vsub.f32 1.0, %v860_v1  ;;  %v885_v27 = vand.u32 2147483648, %v662_v51  ;;  %v883_v29 = vand.u32 2147483647, %v662_v51  ;;  %v2412_v39 = vperm.slane %v2175_v0, 1 }
 0x12f   : > { %v848_v4 = vadd.f32 %v1836_v43, %v847_v62 }
 0x130   : > { %v862_v10 = vmul.f32 %v1840_v57, %v861_v5  ;;  %v886_v33 = vor.u32 1.1754944e-38, %v885_v27  ;;  %vm884_vm2 = vcmp.eq.f32.partialorder %v883_v29, 8.507059e+37 }
 0x131   : > { %v852_v9 = vsel %vm851_vm9, %v1836_v43, %v848_v4 }
 0x132   : > { %1667 = vmatmul.msk.f32.gmra.mxu3 %vm3004_vm7, %v913_v44  ;;  %v1842_v60 = vpop.eup %1841  ;;  %v857_v55 = vsel %vm854_vm10, %v856_v8, %v852_v9  ;;  %v863_v16 = vadd.f32 %v1840_v57, %v862_v10 }
 0x133   : > { %v663_v3 = vadd.f32 1.0, %v1842_v60  ;;  %v1844_v6 = vpop.eup %1843  ;;  %v916_v63 = vmul.f32 %v857_v55, %v2320_v35 }
 0x134   : > { %v875_v13 = vmul.f32 %v1844_v6, %v662_v51  ;;  %v867_v22 = vsel %vm866_vm13, %v1840_v57, %v863_v16  ;;  %vm880_vm0 = vweird.f32 %v1844_v6 }
 0x135   : > { %1845 = vrcp.f32 %v663_v3  ;;  %v872_v26 = vsel %vm869_vm14, %v871_v21, %v867_v22  ;;  %vm881_vm1 = vmor %vm879_vm15, %vm880_vm0  ;;  %vm894_vm3 = vweird.f32 %v663_v3  ;;  %v900_v17 = vand.u32 2147483648, %v663_v3 }
 0x136   : > { %v876_v19 = vsub.f32 1.0, %v875_v13  ;;  %v917_v31 = vmul.f32 %v872_v26, %v2333_v37  ;;  %v898_v40 = vand.u32 2147483647, %v663_v3 }
 0x137   : > { %v901_v41 = vor.u32 1.1754944e-38, %v900_v17 }
 0x138   : > { %v877_v23 = vmul.f32 %v1844_v6, %v876_v19  ;;  %vm899_vm6 = vcmp.eq.f32.partialorder %v898_v40, 8.507059e+37 }
 0x13a   : > { %1668 = vmatmul.msk.f32.gmra.mxu3 %vm3004_vm7, %v914_v58  ;;  %v878_v28 = vadd.f32 %v1844_v6, %v877_v23 }
 0x13b   : > { %v1846_v20 = vpop.eup %1845 }
 0x13c   : > { %v890_v25 = vmul.f32 %v1846_v20, %v663_v3  ;;  %v882_v12 = vsel %vm881_vm1, %v1844_v6, %v878_v28  ;;  %vm895_vm4 = vweird.f32 %v1846_v20 }
 0x13d   : > { %v887_v34 = vsel %vm884_vm2, %v886_v33, %v882_v12  ;;  %vm896_vm5 = vmor %vm894_vm3, %vm895_vm4 }
 0x13e   : > { %v891_v30 = vsub.f32 1.0, %v890_v25  ;;  %v918_v36 = vmul.f32 %v887_v34, %v2349_v14 }
 0x140   : > { %v892_v35 = vmul.f32 %v1846_v20, %v891_v30 }
 0x142   : > { %1669 = vmatmul.msk.f32.gmra.mxu3 %vm3004_vm7, %v915_v7  ;;  %v893_v38 = vadd.f32 %v1846_v20, %v892_v35 }
 0x144   : > { %v897_v42 = vsel %vm896_vm5, %v1846_v20, %v893_v38 }
 0x145   : > { %v902_v37 = vsel %vm899_vm6, %v901_v41, %v897_v42 }
 0x146   : > { %v919_v43 = vmul.f32 %v902_v37, %v2376_v11 }
 0x14a   : > { %1670 = vmatmul.msk.f32.gmra.mxu3 %vm3004_vm7, %v916_v63 }
 0x152   : > { %1671 = vmatmul.msk.f32.gmra.mxu3 %vm3004_vm7, %v917_v31 }
 0x15a   : > { %1672 = vmatmul.msk.f32.gmra.mxu3 %vm3004_vm7, %v918_v36 }
 0x162   : > { %1673 = vmatmul.msk.f32.gmra.mxu3 %vm3004_vm7, %v919_v43 }
 0x167   : > { %v991_v44 = vpop.f32.mrf.mxu1 }
 0x168   : > { %v2415_v32 = vadd.f32 %v991_v44, %v2412_v39 }
 0x16a   : > { %3020 = vst [vmem:[#allocation20_spill] sm:$0xff] %v2415_v32  ;;  %v1674_v52 = vmul.f32 -1.442695, %v2415_v32 }
 0x16c   : > { %1847 = vpow2.f32 %v1674_v52 }
 0x16f   : > { %v994_v45 = vpop.f32.mrf.mxu1 }
 0x170   : > { %v2419_v11 = vadd.f32 %v994_v45, %v2412_v39 }
 0x172   : > { %3021 = vst [vmem:[#allocation21_spill] sm:$0xff] %v2419_v11  ;;  %v1675_v54 = vmul.f32 -1.442695, %v2419_v11  ;;  %v1848_v58 = vpop.eup %1847 }
 0x173   : > { %v2431_v62 = vadd.f32 1.0, %v1848_v58 }
 0x174   : > { %1849 = vpow2.f32 %v1675_v54 }
 0x175   : > { %3025 = vst [vmem:[#allocation25_spill] sm:$0xff] %v2431_v62  ;;  %1851 = vrcp.f32 %v2431_v62 }
 0x177   : > { %v997_v46 = vpop.f32.mrf.mxu1 }
 0x178   : > { %v2423_v47 = vadd.f32 %v997_v46, %v2412_v39 }
 0x17a   : > { %3022 = vst [vmem:[#allocation22_spill] sm:$0xff] %v2423_v47  ;;  %v1676_v59 = vmul.f32 -1.442695, %v2423_v47  ;;  %v1850_v5 = vpop.eup %1849 }
 0x17b   : > { %v2454_v55 = vadd.f32 1.0, %v1850_v5  ;;  %v2468_v21 = vpop.eup %1851 }
 0x17c   : > { %1853 = vpow2.f32 %v1676_v59 }
 0x17f   : > { %v1000_v24 = vpop.f32.mrf.mxu1 }
 0x180   : > { %v2426_v60 = vadd.f32 %v1000_v24, %v2412_v39 }
 0x182   : > { %3023 = vst [vmem:[#allocation23_spill] sm:$0xff] %v2426_v60  ;;  %v1677_v4 = vmul.f32 -1.442695, %v2426_v60  ;;  %v1854_v25 = vpop.eup %1853 }
 0x183   : > { %v2478_v12 = vadd.f32 1.0, %v1854_v25 }
 0x184   : > { %1855 = vpow2.f32 %v1677_v4 }
 0x185   : > { %3031 = vst [vmem:[#allocation31_spill] sm:$0xff] %v2478_v12 }
 0x187   : > { %v1003_v48 = vpop.f32.mrf.mxu1 }
 0x188   : > { %v2429_v61 = vadd.f32 %v1003_v48, %v2412_v39 }
 0x18a   : > { %3024 = vst [vmem:[#allocation24_spill] sm:$0xff] %v2429_v61  ;;  %v1678_v6 = vmul.f32 -1.442695, %v2429_v61  ;;  %v1856_v28 = vpop.eup %1855 }
 0x18b   : > { %v2480_v34 = vadd.f32 1.0, %v1856_v28 }
 0x18c   : > { %1857 = vpow2.f32 %v1678_v6 }
 0x18f   : > { %v1006_v14 = vpop.f32.mrf.mxu1 }
 0x190   : > { %v2434_v1 = vadd.f32 %v1006_v14, %v2412_v39 }
 0x192   : > { %3026 = vst [vmem:[#allocation26_spill] sm:$0xff] %v2434_v1  ;;  %v1679_v8 = vmul.f32 -1.442695, %v2434_v1  ;;  %v1858_v30 = vpop.eup %1857 }
 0x193   : > { %v2484_v38 = vadd.f32 1.0, %v1858_v30 }
 0x194   : > { %1859 = vpow2.f32 %v1679_v8 }
 0x197   : > { %v1009_v53 = vpop.f32.mrf.mxu1 }
 0x198   : > { %v2438_v3 = vadd.f32 %v1009_v53, %v2412_v39 }
 0x19a   : > { %3027 = vst [vmem:[#allocation27_spill] sm:$0xff] %v2438_v3  ;;  %v1680_v10 = vmul.f32 -1.442695, %v2438_v3  ;;  %v1860_v33 = vpop.eup %1859 }
 0x19b   : > { %v2486_v36 = vadd.f32 1.0, %v1860_v33 }
 0x19c   : > { %1861 = vpow2.f32 %v1680_v10 }
 0x19d   : > { %1863 = vrcp.f32 %v2454_v55 }
 0x19f   : > { %v1012_v2 = vpop.f32.mrf.mxu1 }
 0x1a0   : > { %v2443_v7 = vadd.f32 %v1012_v2, %v2412_v39 }
 0x1a2   : > { %3028 = vst [vmem:[#allocation28_spill] sm:$0xff] %v2443_v7  ;;  %v1681_v16 = vmul.f32 -1.442695, %v2443_v7  ;;  %v1862_v35 = vpop.eup %1861 }
 0x1a3   : > { %v2482_v17 = vpop.eup %1863  ;;  %v2489_v42 = vadd.f32 1.0, %v1862_v35 }
 0x1a4   : > { %1865 = vpow2.f32 %v1681_v16  ;;  %v1119_v25 = vmul.f32 %v2482_v17, %v2454_v55 }
 0x1aa   : > { %v1866_v40 = vpop.eup %1865 }
 0x1ab   : > { %v2496_v46 = vadd.f32 1.0, %v1866_v40 }
 0x1ad   : > { %v1015_v49 = vpop.f32.mrf.mxu3 }
 0x1ae   : > { %v2448_v9 = vadd.f32 %v1015_v49, %v2412_v39 }
 0x1b0   : > { %3029 = vst [vmem:[#allocation29_spill] sm:$0xff] %v2448_v9  ;;  %v1682_v19 = vmul.f32 -1.442695, %v2448_v9 }
 0x1b2   : > { %1867 = vpow2.f32 %v1682_v19 }
 0x1b5   : > { %v1018_v50 = vpop.f32.mrf.mxu3 }
 0x1b6   : > { %v2452_v13 = vadd.f32 %v1018_v50, %v2412_v39 }
 0x1b8   : > { %3030 = vst [vmem:[#allocation30_spill] sm:$0xff] %v2452_v13  ;;  %v1683_v63 = vmul.f32 -1.442695, %v2452_v13  ;;  %v1868_v41 = vpop.eup %1867 }
 0x1b9   : > { %v2499_v48 = vadd.f32 1.0, %v1868_v41 }
 0x1ba   : > { %1869 = vpow2.f32 %v1683_v63 }
 0x1bd   : > { %v1021_v51 = vpop.f32.mrf.mxu3 }
 0x1be   : > { %v2457_v15 = vadd.f32 %v1021_v51, %v2412_v39 }
 0x1c0   : > { %v1684_v22 = vmul.f32 -1.442695, %v2457_v15  ;;  %v1870_v43 = vpop.eup %1869 }
 0x1c1   : > { %v2503_v14 = vadd.f32 1.0, %v1870_v43 }
 0x1c2   : > { %1871 = vpow2.f32 %v1684_v22  ;;  %v1104_v22 = vmul.f32 %v2468_v21, %v2431_v62 }
 0x1c4   : > { %v1105_v35 = vsub.f32 1.0, %v1104_v22 }
 0x1c5   : > { %v1024_v57 = vpop.f32.mrf.mxu3 }
 0x1c6   : > { %v2461_v18 = vadd.f32 %v1024_v57, %v2412_v39  ;;  %v2592_v13 = vmul.f32 %v2468_v21, %v1105_v35 }
 0x1c8   : > { %v1685_v26 = vmul.f32 -1.442695, %v2461_v18  ;;  %v1872_v45 = vpop.eup %1871  ;;  %3032 = vst [vmem:[#allocation32_spill] sm:$0xff] %v2592_v13 }
 0x1c9   : > { %v2505_v52 = vadd.f32 1.0, %v1872_v45  ;;  %v1120_v45 = vsub.f32 1.0, %v1119_v25 }
 0x1ca   : > { %1873 = vpow2.f32 %v1685_v26 }
 0x1cb   : > { %v2589_v9 = vmul.f32 %v2482_v17, %v1120_v45  ;;  %vm1258_vm0 = vweird.f32 %v2505_v52 }
 0x1cd   : > { %v1027_v56 = vpop.f32.mrf.mxu3 }
 0x1ce   : > { %v2465_v20 = vadd.f32 %v1027_v56, %v2412_v39 }
 0x1d0   : > { %v1686_v29 = vmul.f32 -1.442695, %v2465_v20  ;;  %v1874_v24 = vpop.eup %1873 }
 0x1d1   : > { %v2510_v54 = vadd.f32 1.0, %v1874_v24 }
 0x1d2   : > { %1875 = vpow2.f32 %v1686_v29 }
 0x1d3   : > { %vm1273_vm12 = vweird.f32 %v2510_v54 }
 0x1d5   : > { %v1030_v23 = vpop.f32.mrf.mxu3 }
 0x1d6   : > { %v2474_v27 = vadd.f32 %v1030_v23, %v2412_v39 }
 0x1d8   : > { %v1687_v31 = vmul.f32 -1.442695, %v2474_v27  ;;  %v1876_v50 = vpop.eup %1875 }
 0x1d9   : > { %v2515_v58 = vadd.f32 1.0, %v1876_v50 }
 0x1da   : > { %1877 = vpow2.f32 %v1687_v31 }
 0x1db   : > { %1879 = vrcp.f32 %v2478_v12  ;;  %vm1288_vm9 = vweird.f32 %v2515_v58 }
 0x1dc   : > { %1881 = vrcp.f32 %v2480_v34 }
 0x1dd   : > { %v1033_v37 = vpop.f32.mrf.mxu3  ;;  %1883 = vrcp.f32 %v2484_v38 }
 0x1de   : > { %v2493_v44 = vadd.f32 %v1033_v37, %v2412_v39  ;;  %1885 = vrcp.f32 %v2486_v36 }
 0x1df   : > { %1887 = vrcp.f32 %v2489_v42 }
 0x1e0   : > { %v1688_v49 = vmul.f32 -1.442695, %v2493_v44  ;;  %v1878_v51 = vpop.eup %1877 }
 0x1e1   : > { %v2507_v53 = vpop.eup %1879  ;;  %v2520_v59 = vadd.f32 1.0, %v1878_v51 }
 0x1e2   : > { %1889 = vpow2.f32 %v1688_v49  ;;  %v2512_v57 = vpop.eup %1881  ;;  %v1134_v30 = vmul.f32 %v2507_v53, %v2478_v12 }
 0x1e3   : > { %1891 = vrcp.f32 %v2496_v46  ;;  %v2517_v2 = vpop.eup %1883  ;;  %v1149_v33 = vmul.f32 %v2512_v57, %v2480_v34  ;;  %vm1303_vm3 = vweird.f32 %v2520_v59 }
 0x1e4   : > { %1893 = vrcp.f32 %v2499_v48  ;;  %v2522_v56 = vpop.eup %1885  ;;  %v1164_v43 = vmul.f32 %v2517_v2, %v2484_v38  ;;  %v1135_v25 = vsub.f32 1.0, %v1134_v30 }
 0x1e5   : > { %1895 = vrcp.f32 %v2503_v14  ;;  %v1036_v4 = vpop.f32.mrf.mxu3  ;;  %v2528_v6 = vpop.eup %1887  ;;  %v1179_v37 = vmul.f32 %v2522_v56, %v2486_v36  ;;  %v1150_v32 = vsub.f32 1.0, %v1149_v33 }
 0x1e6   : > { %1897 = vrcp.f32 %v2505_v52  ;;  %v2526_v5 = vadd.f32 %v1036_v4, %v2412_v39  ;;  %v1194_v41 = vmul.f32 %v2528_v6, %v2489_v42  ;;  %v1165_v60 = vsub.f32 1.0, %v1164_v43 }
 0x1e7   : > { %1899 = vrcp.f32 %v2510_v54  ;;  %v1180_v47 = vsub.f32 1.0, %v1179_v37  ;;  %v2598_v37 = vmul.f32 %v2507_v53, %v1135_v25 }
 0x1e8   : > { %v1890_v8 = vpop.eup %1889  ;;  %1901 = vrcp.f32 %v2515_v58  ;;  %v1689_v10 = vmul.f32 -1.442695, %v2526_v5  ;;  %v1195_v11 = vsub.f32 1.0, %v1194_v41  ;;  %v2595_v41 = vmul.f32 %v2512_v57, %v1150_v32 }
 0x1e9   : > { %v2533_v16 = vpop.eup %1891  ;;  %1903 = vrcp.f32 %v2520_v59  ;;  %v2536_v19 = vadd.f32 1.0, %v1890_v8  ;;  %v2608_v45 = vmul.f32 %v2517_v2, %v1165_v60 }
 0x1ea   : > { %v2538_v63 = vpop.eup %1893  ;;  %1905 = vpow2.f32 %v1689_v10  ;;  %v1209_v28 = vmul.f32 %v2533_v16, %v2496_v46 }
 0x1eb   : > { %v2540_v39 = vpop.eup %1895  ;;  %1907 = vrcp.f32 %v2536_v19  ;;  %v1224_v51 = vmul.f32 %v2538_v63, %v2499_v48  ;;  %vm1318_vm14 = vweird.f32 %v2536_v19  ;;  %v1324_v25 = vand.u32 2147483648, %v2536_v19 }
 0x1ec   : > { %v2545_v23 = vpop.eup %1897  ;;  %v1239_v50 = vmul.f32 %v2540_v39, %v2503_v14  ;;  %v1210_v4 = vsub.f32 1.0, %v1209_v28  ;;  %vm1244_vm1 = vweird.f32 %v2540_v39 }
 0x1ed   : > { %v2549_v26 = vpop.eup %1899  ;;  %v1254_v22 = vmul.f32 %v2545_v23, %v2505_v52  ;;  %v1225_v1 = vsub.f32 1.0, %v1224_v51  ;;  %v2605_v51 = vmul.f32 %v2522_v56, %v1180_v47  ;;  %vm1259_vm13 = vweird.f32 %v2545_v23 }
 0x1ee   : > { %v2553_v29 = vpop.eup %1901  ;;  %v1269_v0 = vmul.f32 %v2549_v26, %v2510_v54  ;;  %v1240_v61 = vsub.f32 1.0, %v1239_v50  ;;  %v1211_v3 = vmul.f32 %v2533_v16, %v1210_v4  ;;  %v2602_v50 = vmul.f32 %v2528_v6, %v1195_v11 }
 0x1ef   : > { %v2557_v31 = vpop.eup %1903  ;;  %v1255_v62 = vsub.f32 1.0, %v1254_v22  ;;  %v2615_v4 = vmul.f32 %v2538_v63, %v1225_v1  ;;  %vm1274_vm8 = vweird.f32 %v2549_v26  ;;  %vm1289_vm4 = vweird.f32 %v2553_v29 }
 0x1f0   : > { %v1906_v40 = vpop.eup %1905  ;;  %v1299_v10 = vmul.f32 %v2557_v31, %v2520_v59  ;;  %v1270_v33 = vsub.f32 1.0, %v1269_v0  ;;  %v2612_v32 = vmul.f32 %v2540_v39, %v1240_v61  ;;  %v1292_v61 = vand.u32 2147483647, %v2515_v58 }
 0x1f1   : > { %v2567_v24 = vpop.eup %1907  ;;  %v2569_v49 = vadd.f32 1.0, %v1906_v40  ;;  %v1284_v40 = vmul.f32 %v2553_v29, %v2515_v58  ;;  %v1256_v60 = vmul.f32 %v2545_v23, %v1255_v62  ;;  %vm1304_vm11 = vweird.f32 %v2557_v31 }
 0x1f2   : > { %v1314_v8 = vmul.f32 %v2567_v24, %v2536_v19  ;;  %v1300_v30 = vsub.f32 1.0, %v1299_v10  ;;  %v1271_v1 = vmul.f32 %v2549_v26, %v1270_v33  ;;  %vm1319_vm10 = vweird.f32 %v2567_v24  ;;  %vm2655_vm6 = vmor %vm1303_vm3, %vm1304_vm11 }
 0x1f3   : > { %1909 = vrcp.f32 %v2569_v49  ;;  %v1285_v12 = vsub.f32 1.0, %v1284_v40  ;;  %v1339_v62 = vand.u32 2147483648, %v2569_v49  ;;  %vm2641_vm2 = vmor %vm1318_vm14, %vm1319_vm10  ;;  %vm1333_vm5 = vweird.f32 %v2569_v49 }
 0x1f4   : > { %v1315_v28 = vsub.f32 1.0, %v1314_v8  ;;  %v2618_v8 = vadd.f32 %v2533_v16, %v1211_v3  ;;  %v1301_v47 = vmul.f32 %v2557_v31, %v1300_v30  ;;  %vm1243_vm10 = vweird.f32 %v2503_v14 }
 0x1f5   : > { %v1286_v10 = vmul.f32 %v2553_v29, %v1285_v12  ;;  %v1322_v12 = vand.u32 2147483647, %v2536_v19  ;;  %v1309_v19 = vand.u32 2147483648, %v2520_v59  ;;  %vm1229_vm14 = vweird.f32 %v2538_v63 }
 0x1f6   : > { %v1316_v43 = vmul.f32 %v2567_v24, %v1315_v28  ;;  %v1337_v28 = vand.u32 2147483647, %v2569_v49  ;;  %v1302_v30 = vadd.f32 %v2557_v31, %v1301_v47  ;;  %vm1214_vm3 = vweird.f32 %v2533_v16 }
 0x1f7   : > { %v1287_v7 = vadd.f32 %v2553_v29, %v1286_v10  ;;  %vm1323_vm11 = vcmp.eq.f32.partialorder %v1322_v12, 8.507059e+37  ;;  %v1310_v13 = vor.u32 1.1754944e-38, %v1309_v19  ;;  %v1257_v12 = vadd.f32 %v2545_v23, %v1256_v60 }
 0x1f8   : > { %v1317_v3 = vadd.f32 %v2567_v24, %v1316_v43  ;;  %v1307_v43 = vand.u32 2147483647, %v2520_v59  ;;  %v1340_v59 = vor.u32 1.1754944e-38, %v1339_v62  ;;  %v1306_v33 = vsel %vm2655_vm6, %v2557_v31, %v1302_v30 }
 0x1f9   : > { %v1910_v35 = vpop.eup %1909  ;;  %vm1199_vm6 = vweird.f32 %v2528_v6  ;;  %v1242_v60 = vadd.f32 %v2540_v39, %v2612_v32 }
 0x1fa   : > { %v1329_v11 = vmul.f32 %v1910_v35, %v2569_v49  ;;  %vm1334_vm15 = vweird.f32 %v1910_v35  ;;  %v1321_v47 = vsel %vm2641_vm2, %v2567_v24, %v1317_v3  ;;  %v1325_v49 = vor.u32 1.1754944e-38, %v1324_v25 }
 0x1fb   : > { %vm1335_vm7 = vmor %vm1333_vm5, %vm1334_vm15  ;;  %v1272_v24 = vadd.f32 %v2549_v26, %v1271_v1  ;;  %vm1338_vm2 = vcmp.eq.f32.partialorder %v1337_v28, 8.507059e+37  ;;  %vm1213_vm5 = vweird.f32 %v2496_v46 }
 0x1fc   : > { %v1330_v22 = vsub.f32 1.0, %v1329_v11  ;;  %v1326_v0 = vsel %vm1323_vm11, %v1325_v49, %v1321_v47  ;;  %vm2673_vm15 = vmor %vm1288_vm9, %vm1289_vm4  ;;  %vm1293_vm4 = vcmp.eq.f32.partialorder %v1292_v61, 8.507059e+37  ;;  %v3043_v61 = vand.u32 2147483647, %v2510_v54 }
 0x1fd   : > { %v1291_v31 = vsel %vm2673_vm15, %v2553_v29, %v1287_v7  ;;  %vm2689_vm9 = vmor %vm1273_vm12, %vm1274_vm8  ;;  %v1264_v7 = vand.u32 2147483648, %v2505_v52  ;;  %v1357_v29 = vmul.f32 %v1326_v0, %v2493_v44  ;;  %vm1198_vm8 = vweird.f32 %v2489_v42 }
 0x1fe   : > { %v1331_v40 = vmul.f32 %v1910_v35, %v1330_v22  ;;  %vm1184_vm12 = vweird.f32 %v2522_v56  ;;  %v1247_v0 = vand.u32 2147483647, %v2503_v14  ;;  %vm1278_vm11 = vcmp.eq.f32.partialorder %v3043_v61, 8.507059e+37  ;;  %vm2727_vm15 = vmor %vm1243_vm10, %vm1244_vm1 }
 0x1ff   : > { %v1265_v47 = vor.u32 1.1754944e-38, %v1264_v7  ;;  %v1232_v22 = vand.u32 2147483647, %v2499_v48  ;;  %vm1154_vm1 = vweird.f32 %v2512_v57  ;;  %v1172_v7 = vand.u32 2147483647, %v2484_v38 }
 0x200   : > { %v1332_v11 = vadd.f32 %v1910_v35, %v1331_v40  ;;  %v1294_v40 = vand.u32 2147483648, %v2515_v58  ;;  %v1137_v61 = vadd.f32 %v2507_v53, %v2598_v37 }
 0x202   : > { %v1336_v3 = vsel %vm1335_vm7, %v1910_v35, %v1332_v11  ;;  %v1279_v35 = vand.u32 2147483648, %v2510_v54  ;;  %vm1308_vm7 = vcmp.eq.f32.partialorder %v1307_v43, 8.507059e+37  ;;  %v1295_v25 = vor.u32 1.1754944e-38, %v1294_v40 }
 0x203   : > { %v1341_v10 = vsel %vm1338_vm2, %v1340_v59, %v1336_v3  ;;  %v1311_v58 = vsel %vm1308_vm7, %v1310_v13, %v1306_v33  ;;  %v1276_v13 = vsel %vm2689_vm9, %v2549_v26, %v1272_v24  ;;  %vm2707_vm2 = vmor %vm1258_vm0, %vm1259_vm13  ;;  %v1249_v26 = vand.u32 2147483648, %v2503_v14 }
 0x204   : > { %v1358_v1 = vmul.f32 %v1341_v10, %v2526_v5  ;;  %v1262_v5 = vand.u32 2147483647, %v2505_v52  ;;  %v1296_v30 = vsel %vm1293_vm4, %v1295_v25, %v1291_v31  ;;  %v1280_v43 = vor.u32 1.1754944e-38, %v1279_v35  ;;  %v3050_v35 = vld [vmem:[#allocation31_spill] sm:$0xff] }
 0x205   : > { %v1356_v32 = vmul.f32 %v1311_v58, %v2474_v27  ;;  %v1261_v19 = vsel %vm2707_vm2, %v2545_v23, %v1257_v12  ;;  %v1227_v52 = vadd.f32 %v2538_v63, %v2615_v4  ;;  %vm1183_vm13 = vweird.f32 %v2486_v36 }
 0x206   : > { %1369 = vmatpush.msrb.mxu2 %v1358_v1  ;;  %vm1169_vm0 = vweird.f32 %v2517_v2  ;;  %v1281_v11 = vsel %vm1278_vm11, %v1280_v43, %v1276_v13  ;;  %vm1228_vm7 = vweird.f32 %v2499_v48  ;;  %v1234_v54 = vand.u32 2147483648, %v2499_v48 }
 0x207   : > { %v1355_v23 = vmul.f32 %v1296_v30, %v2465_v20  ;;  %vm1263_vm9 = vcmp.eq.f32.partialorder %v1262_v5, 8.507059e+37  ;;  %v1246_v4 = vsel %vm2727_vm15, %v2540_v39, %v1242_v60  ;;  %vm1168_vm4 = vweird.f32 %v2484_v38  ;;  %vm2742_vm10 = vmor %vm1228_vm7, %vm1229_vm14  ;;  %v3057_v60 = vld [vmem:[#allocation25_spill] sm:$0xff] }
 0x208   : > { %1370 = vmatpush.msrb.mxu2 %v1357_v29  ;;  %v1266_v14 = vsel %vm1263_vm9, %v1265_v47, %v1261_v19  ;;  %v1250_v59 = vor.u32 1.1754944e-38, %v1249_v26  ;;  %v1217_v20 = vand.u32 2147483647, %v2496_v46  ;;  %v1219_v40 = vand.u32 2147483648, %v2496_v46  ;;  %vm2760_vm15 = vmor %vm1213_vm5, %vm1214_vm3 }
 0x209   : > { %v1354_v39 = vmul.f32 %v1281_v11, %v2461_v18  ;;  %vm1248_vm2 = vcmp.eq.f32.partialorder %v1247_v0, 8.507059e+37  ;;  %v1231_v48 = vsel %vm2742_vm10, %v2538_v63, %v1227_v52  ;;  %v1197_v24 = vadd.f32 %v2528_v6, %v2602_v50  ;;  %vm2779_vm9 = vmor %vm1198_vm8, %vm1199_vm6  ;;  %v3070_v18 = vld [vmem:[#allocation24_spill] sm:$0xff] }
 0x20a   : > { %1371 = vmatpush.msrb.mxu2 %v1356_v32  ;;  %vm1153_vm14 = vweird.f32 %v2480_v34  ;;  %vm1139_vm11 = vweird.f32 %v2507_v53  ;;  %v1251_v3 = vsel %vm1248_vm2, %v1250_v59, %v1246_v4  ;;  %v1235_v33 = vor.u32 1.1754944e-38, %v1234_v54  ;;  %vm2797_vm2 = vmor %vm1183_vm13, %vm1184_vm12 }
 0x20b   : > { %v1202_v10 = vand.u32 2147483647, %v2489_v42  ;;  %v1204_v63 = vand.u32 2147483648, %v2489_v42  ;;  %v1353_v50 = vmul.f32 %v1266_v14, %v2457_v15  ;;  %vm1233_vm7 = vcmp.eq.f32.partialorder %v1232_v22, 8.507059e+37  ;;  %vm2814_vm13 = vmor %vm1168_vm4, %vm1169_vm0 }
 0x20c   : > { %1372 = vmatpush.msrb.mxu2 %v1355_v23  ;;  %v1216_v62 = vsel %vm2760_vm15, %v2533_v16, %v2618_v8  ;;  %v1182_v46 = vadd.f32 %v2522_v56, %v2605_v51  ;;  %vm1138_vm3 = vweird.f32 %v3050_v35  ;;  %vm1124_vm5 = vweird.f32 %v2482_v17  ;;  %v3053_v51 = vld [vmem:[#allocation30_spill] sm:$0xff]  ;;  %vm2831_vm0 = vmor %vm1153_vm14, %vm1154_vm1 }
 0x20d   : > { %v1236_v1 = vsel %vm1233_vm7, %v1235_v33, %v1231_v48  ;;  %v1220_v31 = vor.u32 1.1754944e-38, %v1219_v40  ;;  %v1187_v12 = vand.u32 2147483647, %v2486_v36  ;;  %v1189_v16 = vand.u32 2147483648, %v2486_v36  ;;  %vm2847_vm1 = vmor %vm1138_vm3, %vm1139_vm11 }
 0x20e   : > { %1373 = vmatpush.msrb.mxu2 %v1354_v39  ;;  %v1352_v8 = vmul.f32 %v1251_v3, %v3053_v51  ;;  %vm1218_vm10 = vcmp.eq.f32.partialorder %v1217_v20, 8.507059e+37  ;;  %v1201_v58 = vsel %vm2779_vm9, %v2528_v6, %v1197_v24  ;;  %v1167_v25 = vadd.f32 %v2517_v2, %v2608_v45  ;;  %v3056_v45 = vld [vmem:[#allocation29_spill] sm:$0xff]  ;;  %v3067_v20 = vld [vmem:[#allocation32_spill] sm:$0xff] }
 0x20f   : > { %vm1123_vm6 = vweird.f32 %v2454_v55  ;;  %vm1109_vm8 = vweird.f32 %v2468_v21  ;;  %v1221_v42 = vsel %vm1218_vm10, %v1220_v31, %v1216_v62  ;;  %v1205_v28 = vor.u32 1.1754944e-38, %v1204_v63 }
 0x210   : > { %1374 = vmatpush.msrb.mxu2 %v1353_v50  ;;  %v1174_v6 = vand.u32 2147483648, %v2484_v38  ;;  %v1351_v29 = vmul.f32 %v1236_v1, %v3056_v45  ;;  %vm1203_vm15 = vcmp.eq.f32.partialorder %v1202_v10, 8.507059e+37  ;;  %v1186_v13 = vsel %vm2797_vm2, %v2522_v56, %v1182_v46  ;;  %v3060_v56 = vld [vmem:[#allocation28_spill] sm:$0xff]  ;;  %vm2867_vm11 = vmor %vm1123_vm6, %vm1124_vm5  ;;  %v3071_v46 = vld [vmem:[#allocation23_spill] sm:$0xff] }
 0x211   : > { %v1152_v36 = vadd.f32 %v2512_v57, %v2595_v41  ;;  %vm1108_vm12 = vweird.f32 %v3057_v60  ;;  %v1206_v30 = vsel %vm1203_vm15, %v1205_v28, %v1201_v58  ;;  %v1190_v43 = vor.u32 1.1754944e-38, %v1189_v16  ;;  %v1363_v58 = vld [vmem:[#allocation3] sm:$0xff] }
 0x212   : > { %1375 = vmatpush.msrb.mxu2 %v1352_v8  ;;  %v1157_v0 = vand.u32 2147483647, %v2480_v34  ;;  %v1159_v26 = vand.u32 2147483648, %v2480_v34  ;;  %v1350_v32 = vmul.f32 %v1221_v42, %v3060_v56  ;;  %vm1188_vm7 = vcmp.eq.f32.partialorder %v1187_v12, 8.507059e+37  ;;  %vm1110_vm5 = vmor %vm1108_vm12, %vm1109_vm8  ;;  %v3075_v28 = vld [vmem:[#allocation20_spill] sm:$0xff] }
 0x213   : > { %v1171_v41 = vsel %vm2814_vm13, %v2517_v2, %v1167_v25  ;;  %v1191_v38 = vsel %vm1188_vm7, %v1190_v43, %v1186_v13  ;;  %v1175_v19 = vor.u32 1.1754944e-38, %v1174_v6  ;;  %v1142_v11 = vand.u32 2147483647, %v3050_v35  ;;  %v3063_v2 = vld [vmem:[#allocation27_spill] sm:$0xff]  ;;  %v3074_v25 = vld [vmem:[#allocation21_spill] sm:$0xff] }
 0x214   : > { %1376 = vmatpush.msrb.mxu2 %v1351_v29  ;;  %v1144_v47 = vand.u32 2147483648, %v3050_v35  ;;  %v1349_v27 = vmul.f32 %v1206_v30, %v3063_v2  ;;  %vm1173_vm4 = vcmp.eq.f32.partialorder %v1172_v7, 8.507059e+37  ;;  %v1156_v37 = vsel %vm2831_vm0, %v2512_v57, %v1152_v36  ;;  %v1359_v57 = vld [vmem:[%s419_s13] sm:$0x1] }
 0x215   : > { %v1122_v54 = vadd.f32 %v2482_v17, %v2589_v9  ;;  %v1176_v34 = vsel %vm1173_vm4, %v1175_v19, %v1171_v41  ;;  %v1160_v23 = vor.u32 1.1754944e-38, %v1159_v26  ;;  %v1129_v22 = vand.u32 2147483648, %v2454_v55  ;;  %v3066_v9 = vld [vmem:[#allocation26_spill] sm:$0xff] }
 0x216   : > { %1377 = vmatpush.msrb.mxu2 %v1350_v32  ;;  %v1361_v14 = vstv %s1690_s0  ;;  %v1348_v59 = vmul.f32 %v1191_v38, %v3066_v9  ;;  %vm1158_vm14 = vcmp.eq.f32.partialorder %v1157_v0, 8.507059e+37  ;;  %v1141_v49 = vsel %vm2847_vm1, %v2507_v53, %v1137_v61 }
 0x217   : > { %v1107_v40 = vadd.f32 %v2468_v21, %v3067_v20  ;;  %v1161_v39 = vsel %vm1158_vm14, %v1160_v23, %v1156_v37  ;;  %v1145_v48 = vor.u32 1.1754944e-38, %v1144_v47  ;;  %v1112_v3 = vand.u32 2147483647, %v3057_v60 }
 0x218   : > { %1378 = vmatpush.msrb.mxu2 %v1349_v27  ;;  %v1114_v33 = vand.u32 2147483648, %v3057_v60  ;;  %v1347_v53 = vmul.f32 %v1176_v34, %v3070_v18  ;;  %vm1143_vm3 = vcmp.eq.f32.partialorder %v1142_v11, 8.507059e+37  ;;  %v1126_v10 = vsel %vm2867_vm11, %v2482_v17, %v1122_v54  ;;  %v3073_v17 = vld [vmem:[#allocation22_spill] sm:$0xff] }
 0x219   : > { %v1362_v63 = vsub.s32 %v1359_v57, %v1361_v14  ;;  %v1146_v50 = vsel %vm1143_vm3, %v1145_v48, %v1141_v49  ;;  %v1130_v62 = vor.u32 1.1754944e-38, %v1129_v22  ;;  %v1346_v35 = vmul.f32 %v1161_v39, %v3071_v46 }
 0x21a   : > { %1379 = vmatpush.msrb.mxu2 %v1348_v59  ;;  %v3072_v1 = vand.u32 2147483647, %v2454_v55  ;;  %v1111_v31 = vsel %vm1110_vm5, %v2468_v21, %v1107_v40  ;;  %v1115_v12 = vor.u32 1.1754944e-38, %v1114_v33  ;;  %v1345_v16 = vmul.f32 %v1146_v50, %v3073_v17  ;;  %v1368_v21 = vld [vmem:[#allocation2] sm:$0xff] }
 0x21b   : > { %vm1113_vm10 = vcmp.eq.f32.partialorder %v1112_v3, 8.507059e+37  ;;  %v1364_v51 = vperm.slane %v1362_v63, 0  ;;  %v2040_v55 = vmov 1.0   ;;  %vm3076_vm8 = vcmask 261120  }
 0x21c   : > { %1380 = vmatpush.msrb.mxu2 %v1347_v53  ;;  %vm1128_vm9 = vcmp.eq.f32.partialorder %v3072_v1, 8.507059e+37  ;;  %v1116_v8 = vsel %vm1113_vm10, %v1115_v12, %v1111_v31 }
 0x21d   : > { %v1131_v15 = vsel %vm1128_vm9, %v1130_v62, %v1126_v10  ;;  %v1343_v5 = vmul.f32 %v1116_v8, %v3075_v28  ;;  %vm1365_vm6 = vcmp.eq.s32.totalorder %v1363_v58, %v1364_v51 }
 0x21e   : > { %1381 = vmatpush.msrb.mxu2 %v1346_v35  ;;  %v1344_v42 = vmul.f32 %v1131_v15, %v3074_v25 }
 0x220   : > { %1382 = vmatpush.msrb.mxu2 %v1345_v16 }
 0x222   : > { %1383 = vmatpush.msrb.mxu2 %v1344_v42 }
 0x224   : > { %1384 = vmatpush.msrb.mxu2 %v1343_v5 }
 0x225   : > { %1692 = vmatmul.msk.f32.vlgmr.msrb.gmra.mxu2 %vm1365_vm6, %v2040_v55 }
 0x2a8   : > { %v1386_v7 = vpop.f32.mrf.mxu2 }
 0x2a9   : > { %v1389_v6 = vadd.f32 %v1386_v7, %v1368_v21 }
 0x2ab   : > { %1390 = vst.msk [vmem:[#allocation2] sm:$0xff] %vm3076_vm8, %v1389_v6 }
 0x2ac PF: > { %p1693_p6 = scmp.ne.s32.totalorder %s2019_s23, 2 }
 0x2ae   : > { %1394 = sbr.rel (%p1693_p6) target bundleno = 994 (0x3e2), region = 64 }
 0x2b3   : > { %v1401_v45 = vld [vmem:[%s2976_s7 + $0x20] sm:$0xff]  ;;  %v1400_v29 = vld [vmem:[%s2976_s7 + $0x18] sm:$0xff]  ;;  %vm1426_vm2 = vcmask 64512   ;;  %v1399_v36 = vld [vmem:[%s2976_s7 + $0x10] sm:$0xff]  ;;  %vm1402_vm15 = vcmask 261120  }
 0x2b4   : > { %1418 = vmatpush.msra.mxu0 %v1401_v45  ;;  %v1396_v13 = vld [vmem:[%s2976_s7] sm:$0xff]  ;;  %v1398_v30 = vld [vmem:[%s2976_s7 + $0x8] sm:$0xff]  ;;  %v1475_v44 = vld [vmem:[%s2977_s8 + $0x18] sm:$0xff] }
 0x2b5   : > { %1445 = vmatpush.msra.mxu1 %v1396_v13  ;;  %v1395_v60 = vld [vmem:[%s2191_s17] sm:$0xff]  ;;  %v1474_v0 = vld [vmem:[%s2977_s8 + $0x10] sm:$0xff]  ;;  %1492 = vmatpush.msra.mxu2 %v1475_v44  ;;  %v1473_v26 = vld [vmem:[%s2977_s8 + $0x8] sm:$0xff] }
 0x2b6   : > { %1419 = vmatpush.msra.mxu0 %v1400_v29  ;;  %1695 = vmatmul.msk.f32.vlgmr.msra.gmra.mxu1 %vm1426_vm2, %v1395_v60  ;;  %v1397_v43 = vld [vmem:[#allocation2] sm:$0xff] }
 0x2b7   : > { %1493 = vmatpush.msra.mxu2 %v1474_v0  ;;  %v1472_v56 = vld [vmem:[%s2977_s8] sm:$0xff] }
 0x2b8   : > { %1420 = vmatpush.msra.mxu0 %v1399_v36  ;;  %v3077_v41 = vld [vmem:[#allocation19_spill] sm:$0xff] }
 0x2b9   : > { %1494 = vmatpush.msra.mxu2 %v1473_v26  ;;  %v1450_v61 = vperm.slane %v3077_v41, 2  ;;  %v1476_v49 = vperm.slane %v3077_v41, 3 }
 0x2ba   : > { %1421 = vmatpush.msra.mxu0 %v1398_v30 }
 0x2bb   : > { %1694 = vmatmul.msk.f32.vlgmr.msra.gmra.mxu0 %vm1402_vm15, %v1397_v43  ;;  %1495 = vmatpush.msra.mxu2 %v1472_v56 }
 0x333   : > { %v1447_v32 = vpop.f32.mrf.mxu1 }
 0x338   : > { %v1423_v38 = vpop.f32.mrf.mxu0 }
 0x339   : > { %v1448_v19 = vadd.f32 %v1447_v32, %v1423_v38 }
 0x33b   : > { %v1451_v52 = vadd.f32 %v1450_v61, %v1448_v19 }
 0x33d   : > { %v1696_v11 = vmul.f32 -1.442695, %v1451_v52 }
 0x33f   : > { %1911 = vpow2.f32 %v1696_v11 }
 0x345   : > { %v1912_v47 = vpop.eup %1911 }
 0x346   : > { %v1455_v2 = vadd.f32 1.0, %v1912_v47 }
 0x348   : > { %1913 = vrcp.f32 %v1455_v2  ;;  %v1467_v34 = vand.u32 2147483648, %v1455_v2  ;;  %v1465_v4 = vand.u32 2147483647, %v1455_v2  ;;  %vm1461_vm13 = vweird.f32 %v1455_v2 }
 0x34a   : > { %v1468_v57 = vor.u32 1.1754944e-38, %v1467_v34  ;;  %vm1466_vm0 = vcmp.eq.f32.partialorder %v1465_v4, 8.507059e+37 }
 0x34e   : > { %v1914_v27 = vpop.eup %1913 }
 0x34f   : > { %v1457_v37 = vmul.f32 %v1914_v27, %v1455_v2  ;;  %vm1462_vm12 = vweird.f32 %v1914_v27 }
 0x350   : > { %vm1463_vm7 = vmor %vm1461_vm13, %vm1462_vm12 }
 0x351   : > { %v1458_v54 = vsub.f32 1.0, %v1457_v37 }
 0x353   : > { %v1459_v23 = vmul.f32 %v1914_v27, %v1458_v54 }
 0x355   : > { %v1460_v22 = vadd.f32 %v1914_v27, %v1459_v23 }
 0x357   : > { %v1464_v14 = vsel %vm1463_vm7, %v1914_v27, %v1460_v22 }
 0x358   : > { %v1469_v9 = vsel %vm1466_vm0, %v1468_v57, %v1464_v14 }
 0x359   : > { %v1471_v59 = vmul.f32 %v1469_v9, %v1451_v52 }
 0x35b   : > { %1697 = vmatmul.msk.f32.vlgmr.msra.gmra.mxu2 %vm1402_vm15, %v1471_v59 }
 0x3de   : > { %v1497_v20 = vpop.f32.mrf.mxu2 }
 0x3df   : > { %v1498_v40 = vadd.f32 %v1497_v20, %v1476_v49 }
 0x3e1   : > { %1500 = vst [vmem:[%s410_s9] sm:$0xff] %v1498_v40 }
 0x3e2 PF: > { %s1699_s13 = sshll.u32 %s2023_s1, 3  ;;  %s1514_s14 = sshll.u32 %s410_s9, 4  ;;  %s1515_s14 = int_to_ptr.vmem [resolvable:$true] %s1514_s14 }
 0x3e3   : > { %s1512_s28 = scalar_lea.hbm %s2979_s10, %s1699_s13  ;;  %s3078_s20 = sand.u32 1, %s2011_s22  }
 0x3e4   : > { %s1516_s18 = sshll.u32 %s1512_s28, 4  ;;  %s1502_s23 = scalar_lea.sflag [#allocation8], %s3078_s20  ;;  %s1517_s18 = int_to_ptr.hbm [resolvable:$true] %s1516_s18 }
 0x3e5   : > { %s1953_s24 = sshra.s32 %s1517_s18, 4  ;;  %s1959_s30 = scalar_lea.hbm %s2979_s10, 24  ;;  %s1954_s24 = int_to_ptr.hbm [resolvable:$true] %s1953_s24 }
 0x3e6   : > { %s1955_s25 = scalar_lea.hbm %s1954_s24, 8  ;;  %p1960_p11 = scmp.lt.s32.totalorder %s1954_s24, %s2979_s10 }
 0x3e7   : > { %p1956_p7 = scmp.ne.s32.totalorder %s1954_s24, %s1955_s25  ;;  %p1961_p12 = scmp.lt.s32.totalorder %s1959_s30, %s1955_s25 }
 0x3e9   : > { %p1957_p8 = pnand %p1956_p7, %p2151_p3  ;;  %p1962_p13 = por %p1961_p12, %p1960_p11 }
 0x3eb   : > { %p1958_p10 = pneg %p1957_p8 }
 0x3ed   : > { %p1963_p0 = pnand %p1962_p13, %p1958_p10 }
 0x3ef   : > { %1966 = shalt.err (!%p1963_p0)
}
 0x3f0   : > { %1708 = dma.vmem_to_hbm [thread:$0]  (%p2151_p3), %s1515_s14, 128, %s1517_s18, %s1502_s23  }
 0x3f1 PF: > { %s3079_s19 = sld [smem:[#allocation11_spill]]  ;;  %p1714_p1 = scmp.ge.s32.totalorder %s2035_s26, 2 }
 0x3f3   : > { %p1711_p2 = pnand %p1714_p1, %p2161_p9 }
 0x3f5   : > { %p1712_p4 = pneg %p1711_p2 }
 0x3f7   : > { %s1528_s21 = sand.u32 1, %s3079_s19  }
 0x3f8   : > { %s1529_s12 = scalar_lea.sflag [#allocation8], %s1528_s21 }
 0x3f9   : > { %2002 = dma.done.wait (%p1712_p4), %s1529_s12, 128  }
 0x3fa   : > { %2004 = vsyncadd (%p1712_p4), %s1529_s12, 4294967168  ;;  %s36_s26 = sadd.s32 1, %s2035_s26   ;;  %s3081_s16 = sld [smem:[#allocation12_spill]] }
 0x3fb   : > { %p33_p5 = scmp.ge.s32.totalorder %s36_s26, 11   ;;  %s3082_s0 = sld [smem:[#allocation18_spill]] }
 0x3fc   : > { %s3083_s23 = sld [smem:[#allocation13_spill]]  ;;  %s3087_s21 = smov %s2011_s22 }
 0x3fd   : > { %s3084_s1 = sld [smem:[#allocation14_spill]]  ;;  %35 = sbr.rel (!%p33_p5) target bundleno = 13 (0xd), region = 105 }
 0x3fe   : > { %s3085_s24 = sld [smem:[#allocation15_spill]] }
 0x3ff   : > { %s3086_s25 = sld [smem:[#allocation16_spill]] }
 0x400   : > { %s3088_s22 = smov %s3081_s16 }
 0x402   :  { %1535 = vsyncpa [#allocation8], 1 }
 0x403   :  { %1537 = vsyncpa [#allocation8 + $0x1], 1 }

</bundles_post_ra>
